<compile_context>
chip_gen: v6e
topology: v6e:2x2x1
jax: 0.10.0
libtpu: 0.0.40
codegen_flags: <defaults>
</compile_context>

<pallas_src>
import functools

import jax
import jax.numpy as jnp
import numpy as np
from jax import lax
from jax.experimental import pallas as pl
from jax.experimental.pallas import tpu as pltpu


def autopad(k, p=None, d=1):
    """Pad to 'same' shape outputs (mirrors the PyTorch helper)."""
    if d > 1:
        k = d * (k - 1) + 1 if isinstance(k, int) else [d * (x - 1) + 1 for x in k]
    if p is None:
        p = k // 2 if isinstance(k, int) else [x // 2 for x in k]
    return p


def _conv_bn_silu_kernel(x_ref, w_ref, scale_ref, bias_ref, o_ref, *,
                         K, d, Ho, Wo, C1, C2):
    """One batch image: K*K shifted-window matmuls + fused BN affine + SiLU."""
    img = x_ref[0]                                    # (Hp, Wp, C1), bf16, loaded once
    acc = jnp.zeros((Ho * Wo, C2), jnp.float32)

    for kw in range(K):                               # static unroll (K is a Python int)
        # Width-shifted slab: the only sublane-shifting slice, done K times (not K*K).
        wslab = img[:, kw * d: kw * d + Wo, :]        # (Hp, Wo, C1)
        for kh in range(K):
            # Height slice along the outermost dim -> cheap vreg-group select.
            patch = wslab[kh * d: kh * d + Ho]        # (Ho, Wo, C1)
            acc = acc + jnp.dot(patch.reshape(Ho * Wo, C1),
                                w_ref[kh * K + kw],
                                preferred_element_type=jnp.float32)

    # Fused inference BatchNorm (per-channel affine) + SiLU, all in f32.
    y = acc * scale_ref[...] + bias_ref[...]          # (Ho*Wo, C2) * (1, C2)
    y = y * jax.nn.sigmoid(y)                         # SiLU (sigmoid on the EUP)
    o_ref[0] = y.reshape(Ho, Wo, C2).astype(o_ref.dtype)


def conv_bn_silu_pallas(x_nchw, W, gamma, beta, running_mean, running_var, *,
                        k=1, s=1, p=None, g=1, d=1, eps=1e-5,
                        mxu_dtype=jnp.bfloat16):
    """act(bn(conv(x))) for the `Conv` module (eval / inference semantics)."""
    if s != 1 or g != 1:
        raise NotImplementedError(
            "conv_bn_silu_pallas supports stride=1, groups=1 (Conv defaults).")

    B, C1, H, Wd = x_nchw.shape
    C2 = W.shape[0]
    pad = autopad(k, p, d)
    Ho = (H + 2 * pad - d * (k - 1) - 1) // s + 1
    Wo = (Wd + 2 * pad - d * (k - 1) - 1) // s + 1
    Hp, Wp = H + 2 * pad, Wd + 2 * pad

    # ---- host-side glue -------------------------------------------------
    x_nhwc = jnp.transpose(x_nchw, (0, 2, 3, 1))
    x_pad = jnp.pad(x_nhwc, ((0, 0), (pad, pad), (pad, pad), (0, 0)))
    x_pad = x_pad.astype(mxu_dtype)

    # Conv weight (C2, C1, K, K) -> per-tap (C1, C2) matrices: (K*K, C1, C2),
    # tap index = kh*K + kw.
    w_taps = jnp.transpose(W, (2, 3, 1, 0)).reshape(k * k, C1, C2)
    w_taps = w_taps.astype(mxu_dtype)

    # Fold inference BatchNorm into per-channel scale / bias (kept in f32).
    inv_std = 1.0 / jnp.sqrt(running_var.astype(jnp.float32) + eps)
    scale = (gamma.astype(jnp.float32) * inv_std).reshape(1, C2)
    bias = (beta.astype(jnp.float32)
            - running_mean.astype(jnp.float32) * gamma.astype(jnp.float32)
            * inv_std).reshape(1, C2)

    kernel = functools.partial(_conv_bn_silu_kernel, K=k, d=d, Ho=Ho, Wo=Wo,
                               C1=C1, C2=C2)

    itemsize = jnp.dtype(mxu_dtype).itemsize
    out_itemsize = jnp.dtype(x_nchw.dtype).itemsize
    cost = pl.CostEstimate(
        flops=2 * B * Ho * Wo * C1 * C2 * k * k,
        transcendentals=B * Ho * Wo * C2,                      # sigmoid
        bytes_accessed=(B * Hp * Wp * C1 * itemsize            # activations in
                        + k * k * C1 * C2 * itemsize           # weights
                        + 2 * C2 * 4                           # scale / bias
                        + B * Ho * Wo * C2 * out_itemsize))    # output

    out_nhwc = pl.pallas_call(
        kernel,
        out_shape=jax.ShapeDtypeStruct((B, Ho, Wo, C2), x_nchw.dtype),
        grid=(B,),
        in_specs=[
            # per-batch padded image
            pl.BlockSpec((1, Hp, Wp, C1), lambda b: (b, 0, 0, 0)),
            # weights + folded BN params: constant index_map -> VMEM-resident
            pl.BlockSpec((k * k, C1, C2), lambda b: (0, 0, 0)),
            pl.BlockSpec((1, C2), lambda b: (0, 0)),
            pl.BlockSpec((1, C2), lambda b: (0, 0)),
        ],
        out_specs=pl.BlockSpec((1, Ho, Wo, C2), lambda b: (b, 0, 0, 0)),
        compiler_params=pltpu.CompilerParams(
            dimension_semantics=("parallel",)),
        cost_estimate=cost,
    )(x_pad, w_taps, scale, bias)

    # NHWC -> NCHW glue to match the PyTorch module's output layout.
    return jnp.transpose(out_nhwc, (0, 3, 1, 2))


def conv_bn_silu_reference(x_nchw, W, gamma, beta, running_mean, running_var, *,
                           k=1, s=1, p=None, g=1, d=1, eps=1e-5):
    """Pure-JAX reference mirroring Conv.forward (eval): SiLU(BN(Conv2d(x)))."""
    pad = autopad(k, p, d)
    y = lax.conv_general_dilated(
        x_nchw, W, window_strides=(s, s), padding=((pad, pad), (pad, pad)),
        rhs_dilation=(d, d), dimension_numbers=("NCHW", "OIHW", "NCHW"),
        feature_group_count=g)
    scale = gamma / jnp.sqrt(running_var + eps)
    bias = beta - running_mean * scale
    y = y * scale.reshape(1, -1, 1, 1) + bias.reshape(1, -1, 1, 1)
    return y * jax.nn.sigmoid(y)


if __name__ == "__main__":
    # Small shapes consistent with the module: batch=2, c1=32 -> c2=64,
    # 16x16 spatial, 3x3 "same"-padded conv (stride 1, groups 1, dilation 1).
    B, c1, c2, H, Wd = 2, 32, 64, 16, 16
    k, s, g, d = 3, 1, 1, 1

    key = jax.random.PRNGKey(0)
    k1, k2, k3, k4, k5, k6 = jax.random.split(key, 6)

    x = jax.random.normal(k1, (B, c1, H, Wd), dtype=jnp.float32)
    W = 0.05 * jax.random.normal(k2, (c2, c1, k, k), dtype=jnp.float32)
    gamma = 1.0 + 0.1 * jax.random.normal(k3, (c2,), dtype=jnp.float32)
    beta = 0.1 * jax.random.normal(k4, (c2,), dtype=jnp.float32)
    running_mean = 0.1 * jax.random.normal(k5, (c2,), dtype=jnp.float32)
    running_var = jax.random.uniform(k6, (c2,), minval=0.5, maxval=1.5,
                                     dtype=jnp.float32)

    out = conv_bn_silu_pallas(x, W, gamma, beta, running_mean, running_var,
                              k=k, s=s, g=g, d=d)
    out = jax.block_until_ready(out)

    ref = conv_bn_silu_reference(x, W, gamma, beta, running_mean, running_var,
                                 k=k, s=s, g=g, d=d)
    # bf16 MXU operands with f32 accumulation -> bf16-level tolerance.
    np.testing.assert_allclose(np.asarray(out), np.asarray(ref),
                               rtol=2e-2, atol=2e-2)
    print("KERNEL_OK")
</pallas_src>

<mosaic_0001>
module attributes {stable_mosaic.version = 11 : i64} {
  func.func @_conv_bn_silu_kernel(%arg0: i32, %arg1: memref<1x18x18x32xbf16, #tpu.memory_space<vmem>>, %arg2: memref<9x32x64xbf16, #tpu.memory_space<vmem>>, %arg3: memref<1x64xf32, #tpu.memory_space<vmem>>, %arg4: memref<1x64xf32, #tpu.memory_space<vmem>>, %arg5: memref<1x16x16x64xf32, #tpu.memory_space<vmem>>) attributes {dimension_semantics = [#tpu.dimension_semantics<parallel>], iteration_bounds = array<i64: 2>, scalar_prefetch = 0 : i64, scratch_operands = 0 : i64, tpu.core_type = #tpu.core_type<tc>, window_params = [{transform_indices = @transform_0, window_bounds = array<i64: 1, 18, 18, 32>}, {pipeline_mode = #tpu.pipeline_mode<synchronous>, transform_indices = @transform_1, window_bounds = array<i64: 9, 32, 64>}, {pipeline_mode = #tpu.pipeline_mode<synchronous>, transform_indices = @transform_2, window_bounds = array<i64: 1, 64>}, {pipeline_mode = #tpu.pipeline_mode<synchronous>, transform_indices = @transform_3, window_bounds = array<i64: 1, 64>}, {transform_indices = @transform_4, window_bounds = array<i64: 1, 16, 16, 64>}]} {
    %c0 = arith.constant 0 : index
    %c0_0 = arith.constant 0 : index
    %c0_1 = arith.constant 0 : index
    %c0_2 = arith.constant 0 : index
    %0 = vector.load %arg1[%c0, %c0_0, %c0_1, %c0_2] : memref<1x18x18x32xbf16, #tpu.memory_space<vmem>>, vector<1x18x18x32xbf16>
    %1 = vector.shape_cast %0 : vector<1x18x18x32xbf16> to vector<18x18x32xbf16>
    %cst = arith.constant 0.000000e+00 : f32
    %2 = vector.broadcast %cst : f32 to vector<256x64xf32>
    %3 = vector.extract_strided_slice %1 {offsets = [0, 0, 0], sizes = [18, 16, 32], strides = [1, 1, 1]} : vector<18x18x32xbf16> to vector<18x16x32xbf16>
    %4 = vector.extract_strided_slice %3 {offsets = [0, 0, 0], sizes = [16, 16, 32], strides = [1, 1, 1]} : vector<18x16x32xbf16> to vector<16x16x32xbf16>
    %5 = vector.shape_cast %4 : vector<16x16x32xbf16> to vector<256x32xbf16>
    %c0_3 = arith.constant 0 : index
    %c0_4 = arith.constant 0 : index
    %c0_5 = arith.constant 0 : index
    %6 = vector.load %arg2[%c0_3, %c0_4, %c0_5] : memref<9x32x64xbf16, #tpu.memory_space<vmem>>, vector<1x32x64xbf16>
    %7 = vector.shape_cast %6 : vector<1x32x64xbf16> to vector<32x64xbf16>
    %cst_6 = arith.constant dense<0.000000e+00> : vector<256x64xf32>
    %8 = tpu.matmul %5, %7, %cst_6 {dimension_numbers = #tpu.dot_dimension_numbers<[1], [0], [0], [1], [0, 0, 1, 1], [], []>} : vector<256x32xbf16>, vector<32x64xbf16>, vector<256x64xf32> -> vector<256x64xf32>
    %9 = arith.addf %2, %8 : vector<256x64xf32>
    %10 = vector.extract_strided_slice %3 {offsets = [1, 0, 0], sizes = [16, 16, 32], strides = [1, 1, 1]} : vector<18x16x32xbf16> to vector<16x16x32xbf16>
    %11 = vector.shape_cast %10 : vector<16x16x32xbf16> to vector<256x32xbf16>
    %c3 = arith.constant 3 : index
    %c0_7 = arith.constant 0 : index
    %c0_8 = arith.constant 0 : index
    %12 = vector.load %arg2[%c3, %c0_7, %c0_8] : memref<9x32x64xbf16, #tpu.memory_space<vmem>>, vector<1x32x64xbf16>
    %13 = vector.shape_cast %12 : vector<1x32x64xbf16> to vector<32x64xbf16>
    %cst_9 = arith.constant dense<0.000000e+00> : vector<256x64xf32>
    %14 = tpu.matmul %11, %13, %cst_9 {dimension_numbers = #tpu.dot_dimension_numbers<[1], [0], [0], [1], [0, 0, 1, 1], [], []>} : vector<256x32xbf16>, vector<32x64xbf16>, vector<256x64xf32> -> vector<256x64xf32>
    %15 = arith.addf %9, %14 : vector<256x64xf32>
    %16 = vector.extract_strided_slice %3 {offsets = [2, 0, 0], sizes = [16, 16, 32], strides = [1, 1, 1]} : vector<18x16x32xbf16> to vector<16x16x32xbf16>
    %17 = vector.shape_cast %16 : vector<16x16x32xbf16> to vector<256x32xbf16>
    %c6 = arith.constant 6 : index
    %c0_10 = arith.constant 0 : index
    %c0_11 = arith.constant 0 : index
    %18 = vector.load %arg2[%c6, %c0_10, %c0_11] : memref<9x32x64xbf16, #tpu.memory_space<vmem>>, vector<1x32x64xbf16>
    %19 = vector.shape_cast %18 : vector<1x32x64xbf16> to vector<32x64xbf16>
    %cst_12 = arith.constant dense<0.000000e+00> : vector<256x64xf32>
    %20 = tpu.matmul %17, %19, %cst_12 {dimension_numbers = #tpu.dot_dimension_numbers<[1], [0], [0], [1], [0, 0, 1, 1], [], []>} : vector<256x32xbf16>, vector<32x64xbf16>, vector<256x64xf32> -> vector<256x64xf32>
    %21 = arith.addf %15, %20 : vector<256x64xf32>
    %22 = vector.extract_strided_slice %1 {offsets = [0, 1, 0], sizes = [18, 16, 32], strides = [1, 1, 1]} : vector<18x18x32xbf16> to vector<18x16x32xbf16>
    %23 = vector.extract_strided_slice %22 {offsets = [0, 0, 0], sizes = [16, 16, 32], strides = [1, 1, 1]} : vector<18x16x32xbf16> to vector<16x16x32xbf16>
    %24 = vector.shape_cast %23 : vector<16x16x32xbf16> to vector<256x32xbf16>
    %c1 = arith.constant 1 : index
    %c0_13 = arith.constant 0 : index
    %c0_14 = arith.constant 0 : index
    %25 = vector.load %arg2[%c1, %c0_13, %c0_14] : memref<9x32x64xbf16, #tpu.memory_space<vmem>>, vector<1x32x64xbf16>
    %26 = vector.shape_cast %25 : vector<1x32x64xbf16> to vector<32x64xbf16>
    %cst_15 = arith.constant dense<0.000000e+00> : vector<256x64xf32>
    %27 = tpu.matmul %24, %26, %cst_15 {dimension_numbers = #tpu.dot_dimension_numbers<[1], [0], [0], [1], [0, 0, 1, 1], [], []>} : vector<256x32xbf16>, vector<32x64xbf16>, vector<256x64xf32> -> vector<256x64xf32>
    %28 = arith.addf %21, %27 : vector<256x64xf32>
    %29 = vector.extract_strided_slice %22 {offsets = [1, 0, 0], sizes = [16, 16, 32], strides = [1, 1, 1]} : vector<18x16x32xbf16> to vector<16x16x32xbf16>
    %30 = vector.shape_cast %29 : vector<16x16x32xbf16> to vector<256x32xbf16>
    %c4 = arith.constant 4 : index
    %c0_16 = arith.constant 0 : index
    %c0_17 = arith.constant 0 : index
    %31 = vector.load %arg2[%c4, %c0_16, %c0_17] : memref<9x32x64xbf16, #tpu.memory_space<vmem>>, vector<1x32x64xbf16>
    %32 = vector.shape_cast %31 : vector<1x32x64xbf16> to vector<32x64xbf16>
    %cst_18 = arith.constant dense<0.000000e+00> : vector<256x64xf32>
    %33 = tpu.matmul %30, %32, %cst_18 {dimension_numbers = #tpu.dot_dimension_numbers<[1], [0], [0], [1], [0, 0, 1, 1], [], []>} : vector<256x32xbf16>, vector<32x64xbf16>, vector<256x64xf32> -> vector<256x64xf32>
    %34 = arith.addf %28, %33 : vector<256x64xf32>
    %35 = vector.extract_strided_slice %22 {offsets = [2, 0, 0], sizes = [16, 16, 32], strides = [1, 1, 1]} : vector<18x16x32xbf16> to vector<16x16x32xbf16>
    %36 = vector.shape_cast %35 : vector<16x16x32xbf16> to vector<256x32xbf16>
    %c7 = arith.constant 7 : index
    %c0_19 = arith.constant 0 : index
    %c0_20 = arith.constant 0 : index
    %37 = vector.load %arg2[%c7, %c0_19, %c0_20] : memref<9x32x64xbf16, #tpu.memory_space<vmem>>, vector<1x32x64xbf16>
    %38 = vector.shape_cast %37 : vector<1x32x64xbf16> to vector<32x64xbf16>
    %cst_21 = arith.constant dense<0.000000e+00> : vector<256x64xf32>
    %39 = tpu.matmul %36, %38, %cst_21 {dimension_numbers = #tpu.dot_dimension_numbers<[1], [0], [0], [1], [0, 0, 1, 1], [], []>} : vector<256x32xbf16>, vector<32x64xbf16>, vector<256x64xf32> -> vector<256x64xf32>
    %40 = arith.addf %34, %39 : vector<256x64xf32>
    %41 = vector.extract_strided_slice %1 {offsets = [0, 2, 0], sizes = [18, 16, 32], strides = [1, 1, 1]} : vector<18x18x32xbf16> to vector<18x16x32xbf16>
    %42 = vector.extract_strided_slice %41 {offsets = [0, 0, 0], sizes = [16, 16, 32], strides = [1, 1, 1]} : vector<18x16x32xbf16> to vector<16x16x32xbf16>
    %43 = vector.shape_cast %42 : vector<16x16x32xbf16> to vector<256x32xbf16>
    %c2 = arith.constant 2 : index
    %c0_22 = arith.constant 0 : index
    %c0_23 = arith.constant 0 : index
    %44 = vector.load %arg2[%c2, %c0_22, %c0_23] : memref<9x32x64xbf16, #tpu.memory_space<vmem>>, vector<1x32x64xbf16>
    %45 = vector.shape_cast %44 : vector<1x32x64xbf16> to vector<32x64xbf16>
    %cst_24 = arith.constant dense<0.000000e+00> : vector<256x64xf32>
    %46 = tpu.matmul %43, %45, %cst_24 {dimension_numbers = #tpu.dot_dimension_numbers<[1], [0], [0], [1], [0, 0, 1, 1], [], []>} : vector<256x32xbf16>, vector<32x64xbf16>, vector<256x64xf32> -> vector<256x64xf32>
    %47 = arith.addf %40, %46 : vector<256x64xf32>
    %48 = vector.extract_strided_slice %41 {offsets = [1, 0, 0], sizes = [16, 16, 32], strides = [1, 1, 1]} : vector<18x16x32xbf16> to vector<16x16x32xbf16>
    %49 = vector.shape_cast %48 : vector<16x16x32xbf16> to vector<256x32xbf16>
    %c5 = arith.constant 5 : index
    %c0_25 = arith.constant 0 : index
    %c0_26 = arith.constant 0 : index
    %50 = vector.load %arg2[%c5, %c0_25, %c0_26] : memref<9x32x64xbf16, #tpu.memory_space<vmem>>, vector<1x32x64xbf16>
    %51 = vector.shape_cast %50 : vector<1x32x64xbf16> to vector<32x64xbf16>
    %cst_27 = arith.constant dense<0.000000e+00> : vector<256x64xf32>
    %52 = tpu.matmul %49, %51, %cst_27 {dimension_numbers = #tpu.dot_dimension_numbers<[1], [0], [0], [1], [0, 0, 1, 1], [], []>} : vector<256x32xbf16>, vector<32x64xbf16>, vector<256x64xf32> -> vector<256x64xf32>
    %53 = arith.addf %47, %52 : vector<256x64xf32>
    %54 = vector.extract_strided_slice %41 {offsets = [2, 0, 0], sizes = [16, 16, 32], strides = [1, 1, 1]} : vector<18x16x32xbf16> to vector<16x16x32xbf16>
    %55 = vector.shape_cast %54 : vector<16x16x32xbf16> to vector<256x32xbf16>
    %c8 = arith.constant 8 : index
    %c0_28 = arith.constant 0 : index
    %c0_29 = arith.constant 0 : index
    %56 = vector.load %arg2[%c8, %c0_28, %c0_29] : memref<9x32x64xbf16, #tpu.memory_space<vmem>>, vector<1x32x64xbf16>
    %57 = vector.shape_cast %56 : vector<1x32x64xbf16> to vector<32x64xbf16>
    %cst_30 = arith.constant dense<0.000000e+00> : vector<256x64xf32>
    %58 = tpu.matmul %55, %57, %cst_30 {dimension_numbers = #tpu.dot_dimension_numbers<[1], [0], [0], [1], [0, 0, 1, 1], [], []>} : vector<256x32xbf16>, vector<32x64xbf16>, vector<256x64xf32> -> vector<256x64xf32>
    %59 = arith.addf %53, %58 : vector<256x64xf32>
    %c0_31 = arith.constant 0 : index
    %c0_32 = arith.constant 0 : index
    %60 = vector.load %arg3[%c0_31, %c0_32] : memref<1x64xf32, #tpu.memory_space<vmem>>, vector<1x64xf32>
    %61 = vector.broadcast %60 : vector<1x64xf32> to vector<256x64xf32>
    %62 = arith.mulf %59, %61 : vector<256x64xf32>
    %c0_33 = arith.constant 0 : index
    %c0_34 = arith.constant 0 : index
    %63 = vector.load %arg4[%c0_33, %c0_34] : memref<1x64xf32, #tpu.memory_space<vmem>>, vector<1x64xf32>
    %64 = vector.broadcast %63 : vector<1x64xf32> to vector<256x64xf32>
    %65 = arith.addf %62, %64 : vector<256x64xf32>
    %66 = arith.negf %65 : vector<256x64xf32>
    %67 = math.exp %66 : vector<256x64xf32>
    %cst_35 = arith.constant 1.000000e+00 : f32
    %68 = vector.broadcast %cst_35 : f32 to vector<256x64xf32>
    %69 = arith.addf %68, %67 : vector<256x64xf32>
    %70 = arith.divf %68, %69 : vector<256x64xf32>
    %71 = arith.mulf %65, %70 : vector<256x64xf32>
    %72 = vector.shape_cast %71 : vector<256x64xf32> to vector<16x16x64xf32>
    %c0_36 = arith.constant 0 : index
    %c0_37 = arith.constant 0 : index
    %c0_38 = arith.constant 0 : index
    %c0_39 = arith.constant 0 : index
    %73 = vector.load %arg5[%c0_36, %c0_37, %c0_38, %c0_39] : memref<1x16x16x64xf32, #tpu.memory_space<vmem>>, vector<1x16x16x64xf32>
    %74 = vector.shape_cast %73 : vector<1x16x16x64xf32> to vector<16x16x64xf32>
    %75 = vector.shape_cast %72 : vector<16x16x64xf32> to vector<1x16x16x64xf32>
    tpu.vector_store %arg5[%c0_36, %c0_37, %c0_38, %c0_39], %75 {strides = array<i32>} : memref<1x16x16x64xf32, #tpu.memory_space<vmem>>, vector<1x16x16x64xf32>,
    return
  }
  func.func @transform_0(%arg0: i32) -> (i32, i32, i32, i32) {
    %c0_i32 = arith.constant 0 : i32
    %c0_i32_0 = arith.constant 0 : i32
    %c0_i32_1 = arith.constant 0 : i32
    %c0_i32_2 = arith.constant 0 : i32
    return %arg0, %c0_i32, %c0_i32_0, %c0_i32_1 : i32, i32, i32, i32
  }
  func.func @transform_1(%arg0: i32) -> (i32, i32, i32) {
    %c0_i32 = arith.constant 0 : i32
    %c0_i32_0 = arith.constant 0 : i32
    %c0_i32_1 = arith.constant 0 : i32
    %c0_i32_2 = arith.constant 0 : i32
    return %c0_i32, %c0_i32_0, %c0_i32_1 : i32, i32, i32
  }
  func.func @transform_2(%arg0: i32) -> (i32, i32) {
    %c0_i32 = arith.constant 0 : i32
    %c0_i32_0 = arith.constant 0 : i32
    %c0_i32_1 = arith.constant 0 : i32
    return %c0_i32, %c0_i32_0 : i32, i32
  }
  func.func @transform_3(%arg0: i32) -> (i32, i32) {
    %c0_i32 = arith.constant 0 : i32
    %c0_i32_0 = arith.constant 0 : i32
    %c0_i32_1 = arith.constant 0 : i32
    return %c0_i32, %c0_i32_0 : i32, i32
  }
  func.func @transform_4(%arg0: i32) -> (i32, i32, i32, i32) {
    %c0_i32 = arith.constant 0 : i32
    %c0_i32_0 = arith.constant 0 : i32
    %c0_i32_1 = arith.constant 0 : i32
    %c0_i32_2 = arith.constant 0 : i32
    return %arg0, %c0_i32, %c0_i32_0, %c0_i32_1 : i32, i32, i32, i32
  }
}

</mosaic_0001>

<bundles_post_ra>
// kernel: tpu_custom_call.1
= control target key start
LH: loop header
LB: loop body
LE: loop exit
PB: predicated region body
PF: predicated region fallthrough
CT: control target
= control target key end

     0   :  { %9 = vsyncpa [#allocation3], 0  ;;  %s6432_s0 = inlined_call_operand.vmem [shape: bf16[2,18,18,32], index: 0, kind: input, shape index: {}]   ;;  %s6433_s1 = inlined_call_operand.vmem [shape: bf16[9,32,64], index: 1, kind: input, shape index: {}]   ;;  %s6434_s2 = inlined_call_operand.vmem [shape: f32[1,64], index: 2, kind: input, shape index: {}]   ;;  %s6435_s3 = inlined_call_operand.vmem [shape: f32[1,64], index: 3, kind: input, shape index: {}]   ;;  %s6436_s4 = inlined_call_operand.hbm [shape: f32[2,16,16,64], index: 4, kind: output, shape index: {}]  }
   0x1   :  { %11 = vsyncpa [#allocation3 + $0x1], 0  ;;  %s4551_s15 = smov 0   ;;  %s4553_s16 = smov 0  }
   0x2   :  { %s4555_s17 = smov 0   ;;  %s4557_s18 = smov 0  }
   0x3 LB: > { %s4572_s19 = sadd.s32 4294967295, %s4521_s18   ;;  %s3430_s20 = sadd.s32 4294967294, %s4521_s18   ;;  %s4521_s18 = sphi %s4557_s18, %s6544_s18   ;;  %s4517_s17 = sphi %s4555_s17, %s6543_s17   ;;  %s4513_s16 = sphi %s4553_s16, %s6542_s16   ;;  %s4509_s15 = sphi %s4551_s15, %s6541_s15  }
   0x4   : > { %s4576_s21 = sadd.s32 1, %s4521_s18   ;;  %s113_s22 = sadd.s32 1, %s4517_s17 }
   0x5   : > { %s110_s23 = ssub.s32 %s4521_s18, %s4576_s21  ;;  %p123_p0 = scmp.ne.s32.totalorder %s4517_s17, %s4513_s16 }
   0x6   : > { %p111_p1 = scmp.eq.s32.totalorder %s110_s23, 0  ;;  %p124_p2 = scmp.eq.s32.totalorder %s4572_s19, 1 }
   0x7   : > { %p129_p3 = scmp.ne.s32.totalorder %s4513_s16, %s4509_s15  ;;  %p130_p4 = scmp.eq.s32.totalorder %s3430_s20, 1 }
   0x8   : > { %s4587_s24 = scalar_select %p111_p1, %s4517_s17, %s113_s22  }
   0x9   : > { %p4589_p5 = por %p124_p2, %p123_p0  ;;  %p4593_p6 = por %p130_p4, %p129_p3 }
   0xa   : > { %p3433_p7 = scmp.ge.s32.totalorder %s4521_s18, 1  ;;  %p165_p8 = scmp.lt.s32.totalorder %s4521_s18, 3 }
   0xc   : > { %p166_p9 = pnand %p3433_p7, %p165_p8 }
   0xe   : > { %169 = sbr.rel (%p166_p9) target bundleno = 574 (0x23e), region = 36 }
  0x13   : > { %v4274_v0 = vld [vmem:[%s6433_s1 + $0x38] sm:$0xff]   ;;  %p191_p10 = scmp.lt.s32.totalorder %s4572_s19, 1  ;;  %v4275_v1 = vld [vmem:[%s6433_s1 + $0x30] sm:$0xff]   ;;  %v4280_v2 = vld [vmem:[%s6433_s1 + $0x8] sm:$0xff]   ;;  %vm2150_vm0 = vcmask 1042432   ;;  %vm2151_vm1 = vcmask 1046532  }
  0x14   : > { %3904 = vmatprep.subr.bf16.mxu0 %v4274_v0  ;;  %4228 = vmatprep.subr.bf16.mxu1 %v4274_v0  ;;  %v4281_v3 = vld [vmem:[%s6433_s1 + $0x68] sm:$0xff]   ;;  %vm352_vm2 = vcmask 261120   ;;  %vm4628_vm3 = vmor %vm2150_vm0, %vm2151_vm1  ;;  %v4291_v19 = vld [vmem:[%s6433_s1 + $0x60] sm:$0xff]   ;;  %vm961_vm4 = vsmask.f32 3328  ;;  %vm3321_vm7 = vcmask 523264  }
  0x15   : > { %s192_s5 = scalar_select %p191_p10, %s4572_s19, 1  ;;  %3905 = vmatpush3.bf16.msra.mxu0 %v4274_v0  ;;  %4230 = vmatpush3.bf16.msra.mxu1 %v4274_v0  ;;  %v4290_v25 = vld [vmem:[%s6433_s1] sm:$0xff]   ;;  %v4705_v29 = vld [vmem:[%s6433_s1 + $0x48] sm:$0xff]   ;;  %v4732_v38 = vld [vmem:[%s6433_s1 + $0x18] sm:$0xff]   ;;  %vm962_vm5 = vsmask.f32 7440 }
  0x16   : > { %3906 = vmatprep.subr.bf16.mxu0 %v4275_v1  ;;  %4229 = vmatprep.subr.bf16.mxu1 %v4275_v1  ;;  %vm4843_vm6 = vmor %vm961_vm4, %vm962_vm5  ;;  %s188_s12 = sand.u32 1, %s4513_s16   ;;  %s3741_s22 = sshll.u32 %s4572_s19, 12 }
  0x17   : > { %s4232_s8 = smul.u32 216, %s192_s5  ;;  %s6182_s14 = sshll.u32 %s188_s12, 8 }
  0x18   : > { %s6203_s20 = scalar_lea.vmem [#allocation2], %s6182_s14  ;;  %s6381_s29 = scalar_lea.hbm %s6436_s4, %s3741_s22 }
  0x19   : > { %s4616_s13 = scalar_lea.vmem %s6432_s0, %s4232_s8  ;;  %3907 = vmatpush3.bf16.msra.mxu0 %v4275_v1  ;;  %4231 = vmatpush3.bf16.msra.mxu1 %v4275_v1  ;;  %s3368_s23 = sshll.u32 %s6203_s20, 4  ;;  %s6383_s23 = int_to_ptr.vmem [resolvable:$true] %s3368_s23 }
  0x1a   : > { %v200_v4 = vld [vmem:[%s4616_s13 + $0xc] sm:$0xf]  ;;  %v4620_v5 = vld [vmem:[%s4616_s13 + $0x10] sm:$0xf]  ;;  %3940 = vmatprep.subr.bf16.mxu1 %v4280_v2  ;;  %3976 = vmatprep.subr.bf16.mxu0 %v4281_v3  ;;  %v4651_v14 = vld [vmem:[%s4616_s13 + $0x18] sm:$0xf] }
  0x1b   : > { %v4623_v6 = vld [vmem:[%s4616_s13 + $0x6c] sm:$0xf]  ;;  %v4626_v7 = vcombine.low %v200_v4, %v4620_v5  ;;  %v4633_v9 = vld [vmem:[%s4616_s13 + $0x70] sm:$0xf]  ;;  %v3601_v10 = vrot.slane %v200_v4, 9  ;;  %v6437_v11 = vrot.slane %v4620_v5, 5 }
  0x1c   : > { %v4638_v12 = vcombine.low %v4623_v6, %v4633_v9  ;;  %v4654_v15 = vld [vmem:[%s4616_s13 + $0x1c] sm:$0xf]  ;;  %v4657_v16 = vld [vmem:[%s4616_s13 + $0x78] sm:$0xf]  ;;  %v4670_v20 = vld [vmem:[%s4616_s13 + $0x24] sm:$0xf] }
  0x1d   : > { %3908 = vmatprep.mubr.msk.bf16.mxu0 %vm352_vm2, %v4626_v7  ;;  %v4646_v13 = vsel %vm4628_vm3, %v3601_v10, %v6437_v11  ;;  %6457 = vst [vmem:[#allocation5_spill] sm:$0xff] %v4654_v15  ;;  %v4660_v17 = vld [vmem:[%s4616_s13 + $0x7c] sm:$0xf]  ;;  %v4664_v18 = vcombine.low %v4651_v14, %v4654_v15  ;;  %v4673_v21 = vld [vmem:[%s4616_s13 + $0x28] sm:$0xf]  ;;  %v989_v30 = vshrl.u32 %v200_v4, 16 }
  0x1e   : > { %3924 = vmatprep.mubr.msk.bf16.mxu1 %vm352_vm2, %v4638_v12  ;;  %v4679_v22 = vcombine.low %v4657_v16, %v4660_v17  ;;  %v4682_v23 = vld [vmem:[%s4616_s13 + $0x84] sm:$0xf]  ;;  %v4685_v24 = vld [vmem:[%s4616_s13 + $0x88] sm:$0xf]  ;;  %v4691_v26 = vld [vmem:[%s4616_s13 + $0x30] sm:$0xf]  ;;  %v4697_v27 = vcombine.low %v4670_v20, %v4673_v21 }
  0x1f   : > { %3909 = vmatmul.mubr.msk.bf16.vlgmr.msra.gmra.mxu0 %vm352_vm2, %v4664_v18  ;;  %v4700_v28 = vld [vmem:[%s4616_s13 + $0x34] sm:$0xf]  ;;  %v4709_v31 = vcombine.low %v4682_v23, %v4685_v24  ;;  %v4712_v32 = vld [vmem:[%s4616_s13 + $0x90] sm:$0xf]  ;;  %v992_v34 = vshll.u32 %v200_v4, 16  ;;  %v991_v43 = vrot.slane %v989_v30, 4 }
  0x20   : > { %3977 = vmatpush3.bf16.msra.mxu0 %v4281_v3  ;;  %3925 = vmatmul.mubr.msk.bf16.vlgmr.msra.gmra.mxu1 %vm352_vm2, %v4679_v22  ;;  %6458 = vst [vmem:[#allocation6_spill] sm:$0xff] %v4700_v28  ;;  %v4715_v33 = vld [vmem:[%s4616_s13 + $0x94] sm:$0xf]  ;;  %v4721_v35 = vcombine.low %v4691_v26, %v4700_v28  ;;  %v4724_v36 = vld [vmem:[%s4616_s13 + $0x3c] sm:$0xf]  ;;  %v998_v53 = vshll.u32 %v4620_v5, 16 }
  0x21   : > { %3978 = vmatprep.subr.bf16.mxu0 %v4291_v19  ;;  %3941 = vmatpush3.bf16.msra.mxu1 %v4280_v2  ;;  %v4727_v37 = vld [vmem:[%s4616_s13 + $0x40] sm:$0xf]  ;;  %v4737_v39 = vld [vmem:[%s4616_s13 + $0x9c] sm:$0xf]  ;;  %v4741_v40 = vcombine.low %v4712_v32, %v4715_v33  ;;  %v994_v44 = vrot.slane %v992_v34, 5  ;;  %v1002_v54 = vshrl.u32 %v4620_v5, 16 }
  0x22   : > { %3912 = vmatprep.mubr.msk.bf16.mxu0 %vm352_vm2, %v4697_v27  ;;  %3942 = vmatprep.subr.bf16.mxu1 %v4290_v25  ;;  %v4744_v41 = vld [vmem:[%s4616_s13 + $0xa0] sm:$0xf]  ;;  %v4749_v42 = vcombine.low %v4724_v36, %v4727_v37  ;;  %v4761_v46 = vld [vmem:[%s4616_s13 + $0x48] sm:$0xf]  ;;  %v4764_v47 = vld [vmem:[%s4616_s13 + $0x4c] sm:$0xf] }
  0x23   : > { %3928 = vmatprep.mubr.msk.bf16.mxu1 %vm352_vm2, %v4709_v31  ;;  %v4755_v45 = vcombine.low %v4737_v39, %v4744_v41  ;;  %v4769_v48 = vld [vmem:[%s4616_s13 + $0xa8] sm:$0xf]  ;;  %v4774_v49 = vld [vmem:[%s4616_s13 + $0xac] sm:$0xf]  ;;  %v4777_v50 = vld [vmem:[%s4616_s13 + $0x54] sm:$0xf]  ;;  %v995_v52 = vor.u32 %v994_v44, %v991_v43  ;;  %v4786_v55 = vcombine.low %v4761_v46, %v4764_v47 }
  0x24   : > { %3979 = vmatpush3.bf16.msra.mxu0 %v4291_v19  ;;  %v4780_v51 = vld [vmem:[%s4616_s13 + $0x58] sm:$0xf]  ;;  %v4789_v56 = vld [vmem:[%s4616_s13 + $0xb4] sm:$0xf]  ;;  %v4800_v59 = vcombine.low %v4769_v48, %v4774_v49  ;;  %v1000_v62 = vrot.slane %v998_v53, 5  ;;  %v1004_v63 = vrot.slane %v1002_v54, 4 }
  0x25   : > { %4048 = vmatprep.subr.bf16.mxu0 %v4705_v29  ;;  %3943 = vmatpush3.bf16.msra.mxu1 %v4290_v25  ;;  %v4793_v57 = vcombine.low %v4777_v50, %v4780_v51  ;;  %v4796_v58 = vld [vmem:[%s4616_s13 + $0xb8] sm:$0xf]  ;;  %v996_v61 = vrot.slane %v995_v52, 4  ;;  %v4809_v0 = vld [vmem:[%s4616_s13 + $0x60] sm:$0xf]  ;;  %s6392_s19 = scalar_lea.sflag [#allocation3], %s188_s12 }
  0x26   : > { %4012 = vmatprep.subr.bf16.mxu1 %v4732_v38  ;;  %6459 = vst [vmem:[#allocation7_spill] sm:$0xff] %v4796_v58  ;;  %v4804_v60 = vcombine.low %v4789_v56, %v4796_v58  ;;  %v4814_v1 = vld [vmem:[%s4616_s13 + $0x64] sm:$0xf]  ;;  %v4817_v2 = vld [vmem:[%s4616_s13 + $0xc0] sm:$0xf]  ;;  %v1005_v4 = vor.u32 %v1004_v63, %v1000_v62  ;;  %s4461_s30 = scalar_lea.vmem %s6383_s23, 4096 }
  0x27   : > { %3913 = vmatmul.mubr.msk.bf16.gmra.mxu0 %vm352_vm2, %v4721_v35  ;;  %6460 = vst [vmem:[#allocation8_spill] sm:$0xff] %v4817_v2  ;;  %v4822_v3 = vld [vmem:[%s4616_s13 + $0xc4] sm:$0xf]  ;;  %v4828_v10 = vcombine.low %v4809_v0, %v4814_v1  ;;  %v4831_v19 = vld [vmem:[%s4616_s13] sm:$0xf]  ;;  %v1001_v53 = vsel %vm4843_vm6, %v996_v61, %v1000_v62  ;;  %v4299_v62 = vld [vmem:[%s6433_s1 + $0x10] sm:$0xff]   ;;  %p4462_p11 = scmp.ne.s32.totalorder %s6383_s23, %s4461_s30 }
  0x28   : > { %3916 = vmatprep.mubr.msk.bf16.mxu0 %vm352_vm2, %v4749_v42  ;;  %3929 = vmatmul.mubr.msk.bf16.gmra.mxu1 %vm352_vm2, %v4741_v40  ;;  %6461 = vst [vmem:[#allocation9_spill] sm:$0xff] %v4822_v3  ;;  %v4834_v25 = vld [vmem:[%s4616_s13 + $0x4] sm:$0xf]  ;;  %v4838_v30 = vcombine.low %v4817_v2, %v4822_v3  ;;  %v4848_v44 = vld [vmem:[%s4616_s13 + $0x14] sm:$0x1]  ;;  %v1006_v52 = vrot.slane %v1005_v4, 4 }
  0x29   : > { %3932 = vmatprep.mubr.msk.bf16.mxu1 %vm352_vm2, %v4755_v45  ;;  %v3474_v34 = vcombine.low %v4831_v19, %v4834_v25  ;;  %v1008_v54 = vshll.u32 %v4848_v44, 16  ;;  %v4300_v61 = vld [vmem:[%s6433_s1 + $0x40] sm:$0xff]   ;;  %p4463_p12 = pnand %p4462_p11, %p4589_p5  ;;  %s4523_s5 = smov [#allocation2]  }
  0x2a   : > { %s4465_s6 = sshll.u32 %s4523_s5, 4  ;;  %s4466_s6 = int_to_ptr.vmem [resolvable:$false] %s4465_s6 }
  0x2b   : > { %v1010_v63 = vrot.slane %v1008_v54, 5  ;;  %v1194_v54 = vshrl.u32 %v4633_v9, 16  ;;  %p4464_p13 = pneg %p4463_p12  ;;  %s4467_s7 = scalar_lea.vmem %s4466_s6, 8192 }
  0x2c   : > { %p4468_p0 = scmp.lt.s32.totalorder %s6383_s23, %s4466_s6  ;;  %p4469_p1 = scmp.lt.s32.totalorder %s4467_s7, %s4461_s30 }
  0x2d   : > { %v1011_v4 = vsel %vm4843_vm6, %v1006_v52, %v1010_v63  ;;  %v1184_v52 = vshll.u32 %v4623_v6, 16  ;;  %v1196_v3 = vrot.slane %v1194_v54, 4 }
  0x2e   : > { %v4862_v11 = vcombine.low %v1001_v53, %v1011_v4  ;;  %v4882_v53 = vld [vmem:[%s6433_s1 + $0x28] sm:$0xff]   ;;  %p4470_p2 = por %p4469_p1, %p4468_p0 }
  0x2f   : > { %3917 = vmatmul.mubr.msk.bf16.gmra.mxu0 %vm352_vm2, %v4786_v55  ;;  %v1186_v4 = vrot.slane %v1184_v52, 5 }
  0x30   : > { %3920 = vmatprep.mubr.msk.bf16.mxu0 %vm352_vm2, %v4793_v57  ;;  %3933 = vmatmul.mubr.msk.bf16.gmra.mxu1 %vm352_vm2, %v4800_v59  ;;  %p4471_p3 = pnand %p4470_p2, %p4464_p13 }
  0x31   : > { %3936 = vmatprep.mubr.msk.bf16.mxu1 %vm352_vm2, %v4804_v60 }
  0x37   : > { %3921 = vmatmul.mubr.msk.bf16.gmra.mxu0 %vm352_vm2, %v4828_v10 }
  0x38   : > { %3980 = vmatprep.mubr.msk.bf16.mxu0 %vm352_vm2, %v4664_v18  ;;  %3937 = vmatmul.mubr.msk.bf16.gmra.mxu1 %vm352_vm2, %v4838_v30 }
  0x39   : > { %3944 = vmatprep.mubr.msk.bf16.mxu1 %vm352_vm2, %v3474_v34  ;;  %v1181_v34 = vshrl.u32 %v4623_v6, 16 }
  0x3b   : > { %v1183_v63 = vrot.slane %v1181_v34, 4  ;;  %v4905_v34 = vld [vmem:[%s4616_s13 + $0x74] sm:$0x1] }
  0x3c   : > { %v1200_v54 = vshll.u32 %v4905_v34, 16 }
  0x3f   : > { %3981 = vmatmul.mubr.msk.bf16.vlgmr.msra.gmra.mxu0 %vm352_vm2, %v4697_v27 }
  0x40   : > { %4049 = vmatpush3.bf16.msra.mxu0 %v4705_v29  ;;  %3984 = vmatprep.mubr.msk.bf16.mxu0 %vm352_vm2, %v4721_v35  ;;  %v1190_v29 = vshll.u32 %v4633_v9, 16 }
  0x41   : > { %3945 = vmatmul.mubr.msk.bf16.vlgmr.msra.gmra.mxu1 %vm352_vm2, %v4626_v7  ;;  %4050 = vmatprep.subr.bf16.mxu0 %v4300_v61  ;;  %v4892_v7 = vld [vmem:[%s6433_s1 + $0x78] sm:$0xff]  }
  0x42   : > { %4013 = vmatpush3.bf16.msra.mxu1 %v4732_v38  ;;  %3948 = vmatprep.mubr.msk.bf16.mxu1 %vm352_vm2, %v4664_v18  ;;  %v1192_v38 = vrot.slane %v1190_v29, 5  ;;  %v1187_v18 = vor.u32 %v1186_v4, %v1183_v63  ;;  %v1016_v63 = vshll.u32 %v4651_v14, 16  ;;  %v1026_v4 = vshrl.u32 %v4654_v15, 16 }
  0x43   : > { %4014 = vmatprep.subr.bf16.mxu1 %v4299_v62 }
  0x44   : > { %4051 = vmatpush3.bf16.msra.mxu0 %v4300_v61  ;;  %v1197_v61 = vor.u32 %v1196_v3, %v1192_v38 }
  0x45   : > { %4120 = vmatprep.subr.bf16.mxu0 %v4882_v53 }
  0x46   : > { %4015 = vmatpush3.bf16.msra.mxu1 %v4299_v62  ;;  %v1188_v62 = vrot.slane %v1187_v18, 4  ;;  %v1198_v29 = vrot.slane %v1197_v61, 4  ;;  %v1018_v18 = vrot.slane %v1016_v63, 5  ;;  %v1064_v63 = vshll.u32 %v4691_v26, 16 }
  0x47   : > { %3985 = vmatmul.mubr.msk.bf16.gmra.mxu0 %vm352_vm2, %v4749_v42  ;;  %4084 = vmatprep.subr.bf16.mxu1 %v4892_v7 }
  0x48   : > { %3988 = vmatprep.mubr.msk.bf16.mxu0 %vm352_vm2, %v4786_v55  ;;  %v1193_v52 = vsel %vm4843_vm6, %v1188_v62, %v1192_v38  ;;  %v1028_v62 = vrot.slane %v1026_v4, 4 }
  0x49   : > { %3949 = vmatmul.mubr.msk.bf16.gmra.mxu1 %vm352_vm2, %v4697_v27  ;;  %v1202_v27 = vrot.slane %v1200_v54, 5  ;;  %v6464_v54 = vrot.slane %v4620_v5, 5  ;;  %v2165_v5 = vrot.slane %v4848_v44, 5 }
  0x4a   : > { %3952 = vmatprep.mubr.msk.bf16.mxu1 %vm352_vm2, %v4721_v35 }
  0x4b   : > { %v1203_v35 = vsel %vm4843_vm6, %v1198_v29, %v1202_v27  ;;  %v2164_v27 = vrot.slane %v6464_v54, 4  ;;  %v1050_v54 = vshrl.u32 %v4673_v21, 16 }
  0x4c   : > { %v4920_v3 = vcombine.low %v1193_v52, %v1203_v35  ;;  %v974_v52 = vshll.u32 %v4834_v25, 16  ;;  %v1037_v35 = vshrl.u32 %v4670_v20, 16 }
  0x4f   : > { %3989 = vmatmul.mubr.msk.bf16.gmra.mxu0 %vm352_vm2, %v4793_v57 }
  0x50   : > { %3992 = vmatprep.mubr.msk.bf16.mxu0 %vm352_vm2, %v4828_v10 }
  0x51   : > { %3953 = vmatmul.mubr.msk.bf16.gmra.mxu1 %vm352_vm2, %v4749_v42  ;;  %v1013_v42 = vshrl.u32 %v4651_v14, 16  ;;  %v968_v14 = vshll.u32 %v4831_v19, 16 }
  0x52   : > { %3956 = vmatprep.mubr.msk.bf16.mxu1 %vm352_vm2, %v4786_v55  ;;  %v1022_v55 = vshll.u32 %v4654_v15, 16  ;;  %v199_v15 = vld [vmem:[%s4616_s13 + $0x8] sm:$0x1] }
  0x53   : > { %v1015_v38 = vrot.slane %v1013_v42, 4  ;;  %v1040_v42 = vshll.u32 %v4670_v20, 16  ;;  %v970_v2 = vrot.slane %v968_v14, 5  ;;  %v1061_v20 = vshrl.u32 %v4691_v26, 16 }
  0x54   : > { %v4936_v61 = vrot.slane %v1022_v55, 5  ;;  %v1074_v55 = vshrl.u32 %v4700_v28, 16  ;;  %v3600_v14 = vrot.slane %v4831_v19, 9  ;;  %v984_v44 = vshll.u32 %v199_v15, 16 }
  0x55   : > { %v1019_v29 = vor.u32 %v1018_v18, %v1015_v38  ;;  %v4956_v38 = vrot.slane %v974_v52, 5  ;;  %v4973_v52 = vld [vmem:[%s4616_s13 + $0x20] sm:$0x1]  ;;  %v2155_v26 = vrot.slane %v4834_v25, 5 }
  0x56   : > { %v1029_v4 = vor.u32 %v1028_v62, %v4936_v61  ;;  %v1039_v62 = vrot.slane %v1037_v35, 4  ;;  %6465 = vst [vmem:[#allocation10_spill] sm:$0xff] %v4973_v52 }
  0x57   : > { %3993 = vmatmul.mubr.msk.bf16.gmra.mxu0 %vm352_vm2, %v4638_v12  ;;  %v4959_v18 = vrot.slane %v1019_v29, 4  ;;  %v1046_v29 = vshll.u32 %v4673_v21, 16  ;;  %v4987_v21 = vsel %vm4628_vm3, %v3600_v14, %v2155_v26 }
  0x58   : > { %3996 = vmatprep.mubr.msk.bf16.mxu0 %vm352_vm2, %v4679_v22  ;;  %6466 = vst [vmem:[#allocation11_spill] sm:$0xff] %v4987_v21 }
  0x59   : > { %3957 = vmatmul.mubr.msk.bf16.gmra.mxu1 %vm352_vm2, %v4793_v57  ;;  %v965_v57 = vshrl.u32 %v4831_v19, 16  ;;  %v2166_v19 = vsel %vm4628_vm3, %v2164_v27, %v2165_v5  ;;  %v1032_v27 = vshll.u32 %v4973_v52, 16  ;;  %v4996_v5 = vrot.slane %v1046_v29, 5 }
  0x5a   : > { %3960 = vmatprep.mubr.msk.bf16.mxu1 %vm352_vm2, %v4828_v10  ;;  %v978_v10 = vshrl.u32 %v4834_v25, 16  ;;  %v2157_v25 = vrot.slane %v2155_v26, 4  ;;  %v1070_v29 = vshll.u32 %v4700_v28, 16  ;;  %v1063_v28 = vrot.slane %v1061_v20, 4  ;;  %v5040_v20 = vld [vmem:[%s4616_s13 + $0x44] sm:$0x1] }
  0x5b   : > { %v1104_v52 = vshll.u32 %v5040_v20, 16 }
  0x5f   : > { %3997 = vmatmul.mubr.msk.bf16.gmra.mxu0 %vm352_vm2, %v4709_v31 }
  0x60   : > { %4000 = vmatprep.mubr.msk.bf16.mxu0 %vm352_vm2, %v4741_v40 }
  0x61   : > { %3961 = vmatmul.mubr.msk.bf16.gmra.mxu1 %vm352_vm2, %v4638_v12  ;;  %v967_v12 = vrot.slane %v965_v57, 4  ;;  %v1042_v57 = vrot.slane %v1040_v42, 5  ;;  %v2158_v42 = vrot.slane %v199_v15, 5  ;;  %v1098_v15 = vshrl.u32 %v4727_v37, 16 }
  0x62   : > { %3964 = vmatprep.mubr.msk.bf16.mxu1 %vm352_vm2, %v4679_v22  ;;  %v980_v22 = vrot.slane %v978_v10, 4  ;;  %v4968_v10 = vrot.slane %v1029_v4, 4  ;;  %v1085_v4 = vshrl.u32 %v4724_v36, 16 }
  0x63   : > { %v971_v58 = vor.u32 %v970_v2, %v967_v12  ;;  %v1088_v2 = vshll.u32 %v4724_v36, 16  ;;  %v1043_v12 = vor.u32 %v1042_v57, %v1039_v62  ;;  %v5000_v14 = vsel %vm4628_vm3, %v2157_v25, %v2158_v42  ;;  %v5003_v36 = vld [vmem:[%s4616_s13 + $0x2c] sm:$0x1] }
  0x64   : > { %v981_v35 = vor.u32 %v980_v22, %v4956_v38  ;;  %6468 = vst [vmem:[#allocation13_spill] sm:$0xff] %v5000_v14  ;;  %6469 = vst [vmem:[#allocation14_spill] sm:$0xff] %v5003_v36  ;;  %v1112_v62 = vshll.u32 %v4761_v46, 16  ;;  %v1122_v57 = vshrl.u32 %v4764_v47, 16  ;;  %v1133_v42 = vshrl.u32 %v4777_v50, 16 }
  0x65   : > { %v972_v26 = vrot.slane %v971_v58, 4  ;;  %v1136_v58 = vshll.u32 %v4777_v50, 16  ;;  %v1044_v25 = vrot.slane %v1043_v12, 4  ;;  %v1056_v22 = vshll.u32 %v5003_v36, 16  ;;  %v5033_v12 = vld [vmem:[%s4616_s13 + $0x38] sm:$0x1] }
  0x66   : > { %v1066_v14 = vrot.slane %v1064_v63, 5  ;;  %v1090_v21 = vrot.slane %v1088_v2, 5  ;;  %v1076_v63 = vrot.slane %v1074_v55, 4  ;;  %v1100_v36 = vrot.slane %v1098_v15, 4 }
  0x67   : > { %4001 = vmatmul.mubr.msk.bf16.gmra.mxu0 %vm352_vm2, %v4755_v45  ;;  %v977_v50 = vsel %vm4843_vm6, %v972_v26, %v4956_v38  ;;  %v1146_v38 = vshrl.u32 %v4780_v51, 16  ;;  %v1058_v2 = vrot.slane %v1056_v22, 5  ;;  %v1157_v15 = vshrl.u32 %v4809_v0, 16 }
  0x68   : > { %4004 = vmatprep.mubr.msk.bf16.mxu0 %vm352_vm2, %v4800_v59  ;;  %v6471_v22 = vrot.slane %v4633_v9, 5  ;;  %v6474_v9 = vshrl.u32 %v4761_v46, 16  ;;  %v1160_v46 = vshll.u32 %v4809_v0, 16 }
  0x69   : > { %3965 = vmatmul.mubr.msk.bf16.gmra.mxu1 %vm352_vm2, %v4709_v31  ;;  %v4990_v31 = vcombine.low %v4646_v13, %v2166_v19  ;;  %v982_v13 = vrot.slane %v981_v35, 4  ;;  %v986_v19 = vrot.slane %v984_v44, 5  ;;  %v5016_v44 = vld [vmem:[%s4616_s13 + $0xcc] sm:$0xf]  ;;  %v1034_v35 = vrot.slane %v1032_v27, 5 }
  0x6a   : > { %3968 = vmatprep.mubr.msk.bf16.mxu1 %vm352_vm2, %v4741_v40  ;;  %v1052_v40 = vrot.slane %v1050_v54, 4  ;;  %v1094_v54 = vshll.u32 %v4727_v37, 16  ;;  %6470 = vst [vmem:[#allocation15_spill] sm:$0xff] %v5016_v44 }
  0x6b   : > { %6467 = vst [vmem:[#allocation12_spill] sm:$0xff] %v4990_v31  ;;  %v5021_v31 = vld [vmem:[%s4616_s13 + $0xd0] sm:$0xf]  ;;  %v987_v27 = vsel %vm4843_vm6, %v982_v13, %v986_v19  ;;  %v1067_v13 = vor.u32 %v1066_v14, %v1063_v28  ;;  %v1080_v19 = vshll.u32 %v5033_v12, 16  ;;  %v1118_v28 = vshll.u32 %v4764_v47, 16 }
  0x6c   : > { %v1053_v37 = vor.u32 %v1052_v40, %v4996_v5  ;;  %v5037_v40 = vrot.slane %v1070_v29, 5  ;;  %v3497_v26 = vcombine.low %v5016_v44, %v5021_v31  ;;  %v3520_v29 = vcombine.low %v977_v50, %v987_v27 }
  0x6d   : > { %v1082_v50 = vrot.slane %v1080_v19, 5  ;;  %v1142_v27 = vshll.u32 %v4780_v51, 16 }
  0x6e   : > { %v1054_v55 = vrot.slane %v1053_v37, 4 }
  0x6f   : > { %4005 = vmatmul.mubr.msk.bf16.gmra.mxu0 %vm352_vm2, %v4804_v60 }
  0x70   : > { %4008 = vmatprep.mubr.msk.bf16.mxu0 %vm352_vm2, %v4838_v30  ;;  %v1087_v30 = vrot.slane %v1085_v4, 4  ;;  %v1025_v4 = vsel %vm4843_vm6, %v4959_v18, %v4936_v61  ;;  %v1049_v61 = vsel %vm4843_vm6, %v1044_v25, %v4996_v5  ;;  %v1077_v18 = vor.u32 %v1076_v63, %v5037_v40 }
  0x71   : > { %3969 = vmatmul.mubr.msk.bf16.gmra.mxu1 %vm352_vm2, %v4755_v45  ;;  %v5042_v45 = vrot.slane %v1094_v54, 5  ;;  %v2221_v5 = vrot.slane %v4905_v34, 5  ;;  %v1068_v25 = vrot.slane %v1067_v13, 4  ;;  %v1111_v63 = vrot.slane %v6474_v9, 4 }
  0x72   : > { %3972 = vmatprep.mubr.msk.bf16.mxu1 %vm352_vm2, %v4800_v59  ;;  %v1035_v59 = vsel %vm4843_vm6, %v4968_v10, %v1034_v35  ;;  %v1091_v54 = vor.u32 %v1090_v21, %v1087_v30  ;;  %v6472_v21 = vrot.slane %v4623_v6, 9  ;;  %v6473_v35 = vmov %v6471_v22 }
  0x73   : > { %v5057_v44 = vcombine.low %v1025_v4, %v1035_v59  ;;  %v1101_v10 = vor.u32 %v1100_v36, %v5042_v45  ;;  %v2220_v37 = vrot.slane %v6473_v35, 4  ;;  %v1059_v36 = vsel %vm4843_vm6, %v1054_v55, %v1058_v2  ;;  %v5090_v2 = vld [vmem:[%s4616_s13 + $0x50] sm:$0x1] }
  0x74   : > { %v2219_v14 = vsel %vm4628_vm3, %v6472_v21, %v6471_v22  ;;  %v1092_v6 = vrot.slane %v1091_v54, 4  ;;  %v1106_v30 = vrot.slane %v1104_v52, 5  ;;  %v1114_v4 = vrot.slane %v1112_v62, 5  ;;  %v5101_v62 = vld [vmem:[%s4616_s13 + $0x5c] sm:$0x1] }
  0x75   : > { %v2222_v34 = vsel %vm4628_vm3, %v2220_v37, %v2221_v5  ;;  %v1124_v59 = vrot.slane %v1122_v57, 4  ;;  %v1102_v51 = vrot.slane %v1101_v10, 4  ;;  %v1135_v52 = vrot.slane %v1133_v42, 4 }
  0x76   : > { %v5087_v55 = vcombine.low %v2219_v14, %v2222_v34  ;;  %v1138_v13 = vrot.slane %v1136_v58, 5  ;;  %v5095_v19 = vcombine.low %v1049_v61, %v1059_v36  ;;  %v5097_v54 = vrot.slane %v1142_v27, 5  ;;  %v5132_v36 = vld [vmem:[%s4616_s13 + $0x68] sm:$0x1]  ;;  %v5152_v34 = vld [vmem:[%s6433_s1 + $0x58] sm:$0xff]  }
  0x77   : > { %4009 = vmatmul.mubr.msk.bf16.gmra.mxu0 %vm352_vm2, %v3497_v26  ;;  %v1078_v26 = vrot.slane %v1077_v18, 4  ;;  %v1148_v22 = vrot.slane %v1146_v38, 4  ;;  %v1166_v57 = vshll.u32 %v4814_v1, 16  ;;  %v4305_v18 = vld [vmem:[%s6433_s1 + $0x20] sm:$0xff]   ;;  %v1073_v42 = vsel %vm4843_vm6, %v1068_v25, %v5037_v40 }
  0x78   : > { %4052 = vmatprep.mubr.msk.bf16.mxu0 %vm352_vm2, %v4862_v11  ;;  %v1097_v58 = vsel %vm4843_vm6, %v1092_v6, %v5042_v45  ;;  %v1115_v38 = vor.u32 %v1114_v4, %v1111_v63  ;;  %v1128_v61 = vshll.u32 %v5090_v2, 16  ;;  %v1139_v40 = vor.u32 %v1138_v13, %v1135_v52  ;;  %v4304_v45 = vld [vmem:[%s6433_s1 + $0x70] sm:$0xff]  }
  0x79   : > { %3973 = vmatmul.mubr.msk.bf16.gmra.mxu1 %vm352_vm2, %v4804_v60  ;;  %v5092_v60 = vrot.slane %v1118_v28, 5  ;;  %v1083_v10 = vsel %vm4843_vm6, %v1078_v26, %v1082_v50  ;;  %v1107_v28 = vsel %vm4843_vm6, %v1102_v51, %v1106_v30  ;;  %v1149_v14 = vor.u32 %v1148_v22, %v5097_v54 }
  0x7a   : > { %4016 = vmatprep.mubr.msk.bf16.mxu1 %vm352_vm2, %v3520_v29  ;;  %v1170_v29 = vshrl.u32 %v4814_v1, 16  ;;  %v1152_v35 = vshll.u32 %v5101_v62, 16  ;;  %v1159_v37 = vrot.slane %v1157_v15, 4  ;;  %v1162_v5 = vrot.slane %v1160_v46, 5 }
  0x7b   : > { %v1125_v21 = vor.u32 %v1124_v59, %v5092_v60  ;;  %v5134_v25 = vrot.slane %v1166_v57, 5  ;;  %v1205_v27 = vshrl.u32 %v4657_v16, 16  ;;  %v5145_v15 = vcombine.low %v1073_v42, %v1083_v10 }
  0x7c   : > { %v1172_v50 = vrot.slane %v1170_v29, 4  ;;  %v5147_v6 = vcombine.low %v1097_v58, %v1107_v28  ;;  %v1130_v9 = vrot.slane %v1128_v61, 5  ;;  %v1140_v63 = vrot.slane %v1139_v40, 4  ;;  %v5186_v28 = vld [vmem:[%s4616_s13 + $0x80] sm:$0x1] }
  0x7d   : > { %v1126_v30 = vrot.slane %v1125_v21, 4  ;;  %v1150_v26 = vrot.slane %v1149_v14, 4  ;;  %v1154_v4 = vrot.slane %v1152_v35, 5  ;;  %v1176_v59 = vshll.u32 %v5132_v36, 16  ;;  %v5191_v14 = vld [vmem:[%s4616_s13 + $0x8c] sm:$0x1] }
  0x7e   : > { %v1208_v51 = vshll.u32 %v4657_v16, 16  ;;  %v1218_v52 = vshrl.u32 %v4660_v17, 16  ;;  %v1173_v13 = vor.u32 %v1172_v50, %v5134_v25  ;;  %v1214_v46 = vshll.u32 %v4660_v17, 16 }
  0x7f   : > { %4053 = vmatmul.mubr.msk.bf16.vlgmr.msra.gmra.mxu0 %vm352_vm2, %v5057_v44  ;;  %v1229_v22 = vshrl.u32 %v4682_v23, 16  ;;  %v1232_v29 = vshll.u32 %v4682_v23, 16  ;;  %v1242_v57 = vshrl.u32 %v4685_v24, 16  ;;  %v1131_v17 = vsel %vm4843_vm6, %v1126_v30, %v1130_v9 }
  0x80   : > { %4121 = vmatpush3.bf16.msra.mxu0 %v4882_v53  ;;  %4056 = vmatprep.mubr.msk.bf16.mxu0 %vm352_vm2, %v5095_v19  ;;  %v5139_v53 = vld [vmem:[%s6433_s1 + $0x88] sm:$0xff]   ;;  %v1238_v23 = vshll.u32 %v4685_v24, 16  ;;  %v1155_v42 = vsel %vm4843_vm6, %v1150_v26, %v1154_v4  ;;  %v1178_v58 = vrot.slane %v1176_v59, 5  ;;  %v1174_v61 = vrot.slane %v1173_v13, 4 }
  0x81   : > { %4017 = vmatmul.mubr.msk.bf16.vlgmr.msra.gmra.mxu1 %vm352_vm2, %v4862_v11  ;;  %4122 = vmatprep.subr.bf16.mxu0 %v4305_v18  ;;  %v1116_v11 = vrot.slane %v1115_v38, 4  ;;  %v1207_v38 = vrot.slane %v1205_v27, 4  ;;  %v1210_v10 = vrot.slane %v1208_v51, 5  ;;  %v1220_v24 = vrot.slane %v1218_v52, 4 }
  0x82   : > { %4085 = vmatpush3.bf16.msra.mxu1 %v4892_v7  ;;  %4020 = vmatprep.mubr.msk.bf16.mxu1 %vm352_vm2, %v5057_v44  ;;  %v1163_v7 = vor.u32 %v1162_v5, %v1159_v37  ;;  %v1231_v21 = vrot.slane %v1229_v22, 4  ;;  %v1234_v40 = vrot.slane %v1232_v29, 5  ;;  %v5193_v35 = vrot.slane %v1238_v23, 5 }
  0x83   : > { %4086 = vmatprep.subr.bf16.mxu1 %v4304_v45  ;;  %v1121_v16 = vsel %vm4843_vm6, %v1116_v11, %v5092_v60  ;;  %v1244_v37 = vrot.slane %v1242_v57, 4  ;;  %v1253_v5 = vshrl.u32 %v4712_v32, 16  ;;  %v1179_v11 = vsel %vm4843_vm6, %v1174_v61, %v1178_v58 }
  0x84   : > { %4123 = vmatpush3.bf16.msra.mxu0 %v4305_v18  ;;  %v1145_v18 = vsel %vm4843_vm6, %v1140_v63, %v5097_v54  ;;  %v1164_v60 = vrot.slane %v1163_v7, 4  ;;  %v5181_v54 = vrot.slane %v1214_v46, 5  ;;  %v1211_v30 = vor.u32 %v1210_v10, %v1207_v38 }
  0x85   : > { %4192 = vmatprep.subr.bf16.mxu0 %v5139_v53  ;;  %v5196_v50 = vcombine.low %v1145_v18, %v1155_v42  ;;  %v1224_v63 = vshll.u32 %v5186_v28, 16  ;;  %v1256_v26 = vshll.u32 %v4712_v32, 16  ;;  %v1266_v4 = vshrl.u32 %v4715_v33, 16 }
  0x86   : > { %4087 = vmatpush3.bf16.msra.mxu1 %v4304_v45  ;;  %v5188_v45 = vcombine.low %v1121_v16, %v1131_v17  ;;  %v1169_v27 = vsel %vm4843_vm6, %v1164_v60, %v5134_v25  ;;  %v1221_v9 = vor.u32 %v1220_v24, %v5181_v54  ;;  %v1235_v7 = vor.u32 %v1234_v40, %v1231_v21  ;;  %v5225_v60 = vld [vmem:[%s4616_s13 + $0x98] sm:$0x1]  ;;  %v5234_v40 = vld [vmem:[%s4616_s13 + $0xa4] sm:$0x1] }
  0x87   : > { %4057 = vmatmul.mubr.msk.bf16.gmra.mxu0 %vm352_vm2, %v5145_v15  ;;  %4156 = vmatprep.subr.bf16.mxu1 %v5152_v34  ;;  %v1248_v59 = vshll.u32 %v5191_v14, 16  ;;  %v1277_v51 = vshrl.u32 %v4737_v39, 16  ;;  %v1280_v52 = vshll.u32 %v4737_v39, 16  ;;  %v1245_v25 = vor.u32 %v1244_v37, %v5193_v35 }
  0x88   : > { %4060 = vmatprep.mubr.msk.bf16.mxu0 %vm352_vm2, %v5147_v6  ;;  %v1262_v13 = vshll.u32 %v4715_v33, 16  ;;  %v1290_v46 = vshrl.u32 %v4744_v41, 16  ;;  %v5217_v32 = vcombine.low %v1169_v27, %v1179_v11  ;;  %v1286_v22 = vshll.u32 %v4744_v41, 16 }
  0x89   : > { %4021 = vmatmul.mubr.msk.bf16.gmra.mxu1 %vm352_vm2, %v5095_v19  ;;  %v1212_v39 = vrot.slane %v1211_v30, 4  ;;  %v1222_v29 = vrot.slane %v1221_v9, 4  ;;  %v1226_v57 = vrot.slane %v1224_v63, 5  ;;  %v1255_v16 = vrot.slane %v1253_v5, 4 }
  0x8a   : > { %4024 = vmatprep.mubr.msk.bf16.mxu1 %vm352_vm2, %v5145_v15  ;;  %v1236_v33 = vrot.slane %v1235_v7, 4  ;;  %v1250_v17 = vrot.slane %v1248_v59, 5  ;;  %v1258_v18 = vrot.slane %v1256_v26, 5  ;;  %v1268_v23 = vrot.slane %v1266_v4, 4 }
  0x8b   : > { %v1246_v42 = vrot.slane %v1245_v25, 4  ;;  %v5227_v58 = vrot.slane %v1262_v13, 5  ;;  %v1279_v41 = vrot.slane %v1277_v51, 4  ;;  %v1282_v38 = vrot.slane %v1280_v52, 5  ;;  %v6475_v51 = vld [vmem:[#allocation7_spill] sm:$0xff] }
  0x8c   : > { %v5229_v61 = vrot.slane %v1286_v22, 5  ;;  %v1292_v10 = vrot.slane %v1290_v46, 4  ;;  %v1301_v24 = vshrl.u32 %v4769_v48, 16  ;;  %v1304_v21 = vshll.u32 %v4769_v48, 16 }
  0x8d   : > { %v1217_v37 = vsel %vm4843_vm6, %v1212_v39, %v5181_v54  ;;  %v1227_v5 = vsel %vm4843_vm6, %v1222_v29, %v1226_v57  ;;  %v1259_v27 = vor.u32 %v1258_v18, %v1255_v16  ;;  %v1272_v11 = vshll.u32 %v5225_v60, 16 }
  0x8e   : > { %v1241_v30 = vsel %vm4843_vm6, %v1236_v33, %v5193_v35  ;;  %v1251_v48 = vsel %vm4843_vm6, %v1246_v42, %v1250_v17  ;;  %v1269_v9 = vor.u32 %v1268_v23, %v5227_v58  ;;  %v1283_v63 = vor.u32 %v1282_v38, %v1279_v41  ;;  %v5269_v17 = vld [vmem:[%s4616_s13 + $0xb0] sm:$0x1] }
  0x8f   : > { %4061 = vmatmul.mubr.msk.bf16.gmra.mxu0 %vm352_vm2, %v5188_v45  ;;  %v1314_v54 = vshrl.u32 %v4774_v49, 16  ;;  %v1293_v26 = vor.u32 %v1292_v10, %v5229_v61  ;;  %v1296_v4 = vshll.u32 %v5234_v40, 16  ;;  %v1310_v7 = vshll.u32 %v4774_v49, 16 }
  0x90   : > { %4064 = vmatprep.mubr.msk.bf16.mxu0 %vm352_vm2, %v5196_v50  ;;  %v1325_v59 = vshrl.u32 %v4789_v56, 16  ;;  %v1328_v35 = vshll.u32 %v4789_v56, 16  ;;  %v1338_v52 = vshrl.u32 %v6475_v51, 16  ;;  %v1334_v25 = vshll.u32 %v6475_v51, 16 }
  0x91   : > { %4025 = vmatmul.mubr.msk.bf16.gmra.mxu1 %vm352_vm2, %v5147_v6  ;;  %v5264_v13 = vcombine.low %v1217_v37, %v1227_v5  ;;  %v5266_v46 = vcombine.low %v1241_v30, %v1251_v48  ;;  %v1260_v49 = vrot.slane %v1259_v27, 4  ;;  %v1274_v22 = vrot.slane %v1272_v11, 5  ;;  %v6476_v37 = vld [vmem:[#allocation8_spill] sm:$0xff]  ;;  %v6477_v11 = vld [vmem:[#allocation9_spill] sm:$0xff] }
  0x92   : > { %4028 = vmatprep.mubr.msk.bf16.mxu1 %vm352_vm2, %v5188_v45  ;;  %v1270_v39 = vrot.slane %v1269_v9, 4  ;;  %v1284_v29 = vrot.slane %v1283_v63, 4  ;;  %v1303_v56 = vrot.slane %v1301_v24, 4  ;;  %v1306_v57 = vrot.slane %v1304_v21, 5  ;;  %v5275_v48 = vld [vmem:[%s4616_s13 + $0xbc] sm:$0x1] }
  0x93   : > { %v1294_v16 = vrot.slane %v1293_v26, 4  ;;  %v1298_v33 = vrot.slane %v1296_v4, 5  ;;  %v1312_v18 = vrot.slane %v1310_v7, 5  ;;  %v1316_v23 = vrot.slane %v1314_v54, 4 }
  0x94   : > { %v1327_v42 = vrot.slane %v1325_v59, 4  ;;  %v1330_v41 = vrot.slane %v1328_v35, 5  ;;  %v1336_v38 = vrot.slane %v1334_v25, 5  ;;  %v1340_v10 = vrot.slane %v1338_v52, 4 }
  0x95   : > { %v1655_v5 = vshrl.u32 %v6476_v37, 16  ;;  %v1658_v27 = vshll.u32 %v6476_v37, 16  ;;  %v1668_v30 = vshrl.u32 %v6477_v11, 16  ;;  %v1265_v24 = vsel %vm4843_vm6, %v1260_v49, %v5227_v58 }
  0x96   : > { %v1275_v21 = vsel %vm4843_vm6, %v1270_v39, %v1274_v22  ;;  %v1307_v9 = vor.u32 %v1306_v57, %v1303_v56  ;;  %v1320_v63 = vshll.u32 %v5269_v17, 16  ;;  %v1289_v54 = vsel %vm4843_vm6, %v1284_v29, %v5229_v61 }
  0x97   : > { %4065 = vmatmul.mubr.msk.bf16.gmra.mxu0 %vm352_vm2, %v5217_v32  ;;  %v1299_v26 = vsel %vm4843_vm6, %v1294_v16, %v1298_v33  ;;  %v1317_v4 = vor.u32 %v1316_v23, %v1312_v18  ;;  %v1664_v7 = vshll.u32 %v6477_v11, 16  ;;  %v1331_v58 = vor.u32 %v1330_v41, %v1327_v42  ;;  %v5303_v23 = vld [vmem:[%s4616_s13 + $0xc8] sm:$0x1] }
  0x98   : > { %4068 = vmatprep.mubr.msk.bf16.mxu0 %vm352_vm2, %v4920_v3  ;;  %v1341_v59 = vor.u32 %v1340_v10, %v1336_v38  ;;  %v1344_v35 = vshll.u32 %v5275_v48, 16  ;;  %v5298_v51 = vcombine.low %v1265_v24, %v1275_v21  ;;  %v5300_v61 = vcombine.low %v1289_v54, %v1299_v26  ;;  %v6478_v26 = vld [vmem:[#allocation5_spill] sm:$0xff] }
  0x99   : > { %4029 = vmatmul.mubr.msk.bf16.gmra.mxu1 %vm352_vm2, %v5196_v50  ;;  %v1308_v52 = vrot.slane %v1307_v9, 4  ;;  %v1322_v25 = vrot.slane %v1320_v63, 5  ;;  %v1657_v49 = vrot.slane %v1655_v5, 4  ;;  %v1318_v22 = vrot.slane %v1317_v4, 4 }
  0x9a   : > { %4032 = vmatprep.mubr.msk.bf16.mxu1 %vm352_vm2, %v5217_v32  ;;  %v1660_v39 = vrot.slane %v1658_v27, 5  ;;  %v1666_v29 = vrot.slane %v1664_v7, 5  ;;  %v1670_v56 = vrot.slane %v1668_v30, 4  ;;  %v1332_v57 = vrot.slane %v1331_v58, 4  ;;  %v5339_v7 = vld [vmem:[%s4616_s13 + $0xd4] sm:$0x1] }
  0x9b   : > { %v1342_v16 = vrot.slane %v1341_v59, 4  ;;  %v1346_v33 = vrot.slane %v1344_v35, 5  ;;  %v1313_v42 = vsel %vm4843_vm6, %v1308_v52, %v1312_v18  ;;  %v1323_v41 = vsel %vm4843_vm6, %v1318_v22, %v1322_v25  ;;  %v6479_v58 = vld [vmem:[#allocation15_spill] sm:$0xff] }
  0x9c   : > { %v1661_v10 = vor.u32 %v1660_v39, %v1657_v49  ;;  %v1671_v37 = vor.u32 %v1670_v56, %v1666_v29  ;;  %v1674_v5 = vshll.u32 %v5303_v23, 16  ;;  %v1337_v27 = vsel %vm4843_vm6, %v1332_v57, %v1336_v38  ;;  %v4438_v49 = vld [vmem:[%s4616_s13 + $0x18] sm:$0xf] }
  0x9d   : > { %v1347_v18 = vsel %vm4843_vm6, %v1342_v16, %v1346_v33  ;;  %v5322_v11 = vcombine.low %v1313_v42, %v1323_v41  ;;  %v2798_v63 = vrot.slane %v5021_v31, 5  ;;  %v2169_v4 = vrot.slane %v6478_v26, 5  ;;  %v6481_v42 = vld [vmem:[#allocation11_spill] sm:$0xff]  ;;  %v6482_v41 = vld [vmem:[#allocation13_spill] sm:$0xff]  ;;  %v6485_v26 = vld [vmem:[#allocation14_spill] sm:$0xff] }
  0x9e   : > { %v5324_v30 = vcombine.low %v1337_v27, %v1347_v18  ;;  %v1662_v24 = vrot.slane %v1661_v10, 4  ;;  %v1672_v21 = vrot.slane %v1671_v37, 4  ;;  %v1676_v9 = vrot.slane %v1674_v5, 5  ;;  %v4439_v37 = vld [vmem:[%s4616_s13 + $0x28] sm:$0xf] }
  0x9f   : > { %4069 = vmatmul.mubr.msk.bf16.gmra.mxu0 %vm352_vm2, %v5264_v13  ;;  %v3678_v59 = vrot.slane %v6479_v58, 9  ;;  %v2801_v35 = vrot.slane %v5339_v7, 5  ;;  %v2800_v25 = vrot.slane %v2798_v63, 4  ;;  %v3602_v22 = vrot.slane %v4438_v49, 9 }
  0xa0   : > { %4072 = vmatprep.mubr.msk.bf16.mxu0 %vm352_vm2, %v5266_v46  ;;  %v1667_v38 = vsel %vm4843_vm6, %v1662_v24, %v1666_v29  ;;  %v1677_v54 = vsel %vm4843_vm6, %v1672_v21, %v1676_v9  ;;  %v2171_v39 = vrot.slane %v2169_v4, 4  ;;  %v6480_v29 = vld [vmem:[#allocation10_spill] sm:$0xff]  ;;  %v6483_v10 = vcombine.low %v6481_v42, %v6482_v41 }
  0xa1   : > { %4033 = vmatmul.mubr.msk.bf16.gmra.mxu1 %vm352_vm2, %v4920_v3  ;;  %v5345_v52 = vcombine.low %v1667_v38, %v1677_v54  ;;  %v2172_v56 = vrot.slane %v6480_v29, 5  ;;  %v5351_v57 = vsel %vm4628_vm3, %v3678_v59, %v2798_v63  ;;  %v5355_v16 = vsel %vm4628_vm3, %v2800_v25, %v2801_v35  ;;  %v6484_v24 = vld [vmem:[#allocation6_spill] sm:$0xff]  ;;  %v4440_v63 = vld [vmem:[%s4616_s13 + $0x24] sm:$0xf]  ;;  %v4441_v35 = vld [vmem:[%s4616_s13 + $0x30] sm:$0xf] }
  0xa2   : > { %4036 = vmatprep.mubr.msk.bf16.mxu1 %vm352_vm2, %v5264_v13  ;;  %v3683_v33 = vcombine.low %v5351_v57, %v5355_v16  ;;  %v2176_v5 = vrot.slane %v4439_v37, 5  ;;  %v2170_v27 = vsel %vm4628_vm3, %v3602_v22, %v2169_v4  ;;  %v2183_v21 = vrot.slane %v6484_v24, 5  ;;  %v4309_v22 = vld [vmem:[%s6433_s1 + $0x80] sm:$0xff]  }
  0xa3   : > { %v2173_v18 = vsel %vm4628_vm3, %v2171_v39, %v2172_v56  ;;  %v3603_v38 = vrot.slane %v4440_v63, 9  ;;  %v2179_v59 = vrot.slane %v6485_v26, 5  ;;  %v3604_v25 = vrot.slane %v4441_v35, 9  ;;  %v6486_v39 = vld [vmem:[#allocation12_spill] sm:$0xff]  ;;  %v4442_v56 = vld [vmem:[%s4616_s13 + $0x40] sm:$0xf] }
  0xa4   : > { %v5375_v9 = vcombine.low %v2170_v27, %v2173_v18  ;;  %v2178_v54 = vrot.slane %v2176_v5, 4  ;;  %v2185_v49 = vrot.slane %v2183_v21, 4  ;;  %v2186_v4 = vrot.slane %v5033_v12, 5 }
  0xa5   : > { %v2177_v12 = vsel %vm4628_vm3, %v3603_v38, %v2176_v5  ;;  %v2190_v42 = vrot.slane %v4442_v56, 5  ;;  %v2184_v41 = vsel %vm4628_vm3, %v3604_v25, %v2183_v21  ;;  %v2193_v24 = vrot.slane %v5040_v20, 5  ;;  %v4444_v21 = vld [vmem:[%s4616_s13 + $0x48] sm:$0xf]  ;;  %v4445_v38 = vld [vmem:[%s4616_s13 + $0x58] sm:$0xf] }
  0xa6   : > { %v2180_v29 = vsel %vm4628_vm3, %v2178_v54, %v2179_v59  ;;  %v2204_v54 = vrot.slane %v4445_v38, 5  ;;  %v2211_v59 = vrot.slane %v4814_v1, 5 }
  0xa7   : > { %4073 = vmatmul.mubr.msk.bf16.gmra.mxu0 %vm352_vm2, %v5298_v51  ;;  %v5407_v37 = vcombine.low %v2177_v12, %v2180_v29  ;;  %v2192_v18 = vrot.slane %v2190_v42, 4  ;;  %v2214_v29 = vrot.slane %v5132_v36, 5  ;;  %v4447_v36 = vld [vmem:[%s4616_s13 + $0x7c] sm:$0xf] }
  0xa8   : > { %4076 = vmatprep.mubr.msk.bf16.mxu0 %vm352_vm2, %v5300_v61  ;;  %v2213_v12 = vrot.slane %v2211_v59, 4  ;;  %v2225_v56 = vrot.slane %v4447_v36, 5 }
  0xa9   : > { %4037 = vmatmul.mubr.msk.bf16.gmra.mxu1 %vm352_vm2, %v5266_v46  ;;  %v2194_v20 = vsel %vm4628_vm3, %v2192_v18, %v2193_v24 }
  0xaa   : > { %4040 = vmatprep.mubr.msk.bf16.mxu1 %vm352_vm2, %v5298_v51 }
  0xaf   : > { %4077 = vmatmul.mubr.msk.bf16.gmra.mxu0 %vm352_vm2, %v5322_v11 }
  0xb0   : > { %4080 = vmatprep.mubr.msk.bf16.mxu0 %vm352_vm2, %v5324_v30 }
  0xb1   : > { %4041 = vmatmul.mubr.msk.bf16.gmra.mxu1 %vm352_vm2, %v5300_v61 }
  0xb2   : > { %4044 = vmatprep.mubr.msk.bf16.mxu1 %vm352_vm2, %v5322_v11 }
  0xb7   : > { %4081 = vmatmul.mubr.msk.bf16.gmra.mxu0 %vm352_vm2, %v5345_v52 }
  0xb8   : > { %4124 = vmatprep.mubr.msk.bf16.mxu0 %vm352_vm2, %v6483_v10  ;;  %v2197_v10 = vrot.slane %v4764_v47, 5  ;;  %v3606_v47 = vrot.slane %v4444_v21, 9  ;;  %v4450_v21 = vld [vmem:[%s4616_s13 + $0x94] sm:$0xf] }
  0xb9   : > { %4045 = vmatmul.mubr.msk.bf16.gmra.mxu1 %vm352_vm2, %v5324_v30 }
  0xba   : > { %4088 = vmatprep.mubr.msk.bf16.mxu1 %vm352_vm2, %v5057_v44  ;;  %v4308_v44 = vld [vmem:[%s6433_s1 + $0x50] sm:$0xff]   ;;  %v2199_v63 = vrot.slane %v2197_v10, 4 }
  0xbf   : > { %4125 = vmatmul.mubr.msk.bf16.vlgmr.msra.gmra.mxu0 %vm352_vm2, %v6486_v39 }
  0xc0   : > { %4193 = vmatpush3.bf16.msra.mxu0 %v5139_v53  ;;  %4128 = vmatprep.mubr.msk.bf16.mxu0 %vm352_vm2, %v5375_v9  ;;  %v2187_v53 = vsel %vm4628_vm3, %v2185_v49, %v2186_v4  ;;  %v4446_v49 = vld [vmem:[%s4616_s13 + $0x54] sm:$0xf] }
  0xc1   : > { %4089 = vmatmul.mubr.msk.bf16.vlgmr.msra.gmra.mxu1 %vm352_vm2, %v5095_v19  ;;  %4194 = vmatprep.subr.bf16.mxu0 %v4309_v22  ;;  %v5409_v5 = vcombine.low %v2184_v41, %v2187_v53  ;;  %v4443_v19 = vld [vmem:[%s4616_s13 + $0x3c] sm:$0xf]  ;;  %v3607_v4 = vrot.slane %v4446_v49, 9  ;;  %v4448_v53 = vld [vmem:[%s4616_s13 + $0x78] sm:$0xf] }
  0xc2   : > { %4157 = vmatpush3.bf16.msra.mxu1 %v5152_v34  ;;  %4092 = vmatprep.mubr.msk.bf16.mxu1 %vm352_vm2, %v5145_v15  ;;  %v3605_v27 = vrot.slane %v4443_v19, 9  ;;  %v2200_v34 = vrot.slane %v5090_v2, 5  ;;  %v2198_v2 = vsel %vm4628_vm3, %v3606_v47, %v2197_v10  ;;  %v3610_v10 = vrot.slane %v4448_v53, 9  ;;  %v4455_v53 = vld [vmem:[%s4616_s13 + $0x9c] sm:$0xf] }
  0xc3   : > { %4158 = vmatprep.subr.bf16.mxu1 %v4308_v44  ;;  %v2205_v1 = vsel %vm4628_vm3, %v3607_v4, %v2204_v54  ;;  %v2228_v19 = vrot.slane %v5186_v28, 5  ;;  %v2239_v28 = vrot.slane %v4450_v21, 5 }
  0xc4   : > { %4195 = vmatpush3.bf16.msra.mxu0 %v4309_v22  ;;  %v2191_v15 = vsel %vm4628_vm3, %v3605_v27, %v2190_v42  ;;  %v2201_v26 = vsel %vm4628_vm3, %v2199_v63, %v2200_v34  ;;  %v2206_v22 = vrot.slane %v2204_v54, 4  ;;  %v4449_v27 = vld [vmem:[%s4616_s13 + $0x88] sm:$0xf]  ;;  %v4451_v63 = vld [vmem:[%s4616_s13 + $0x84] sm:$0xf] }
  0xc5   : > { %v5433_v35 = vcombine.low %v2191_v15, %v2194_v20  ;;  %v5435_v25 = vcombine.low %v2198_v2, %v2201_v26  ;;  %v2232_v18 = vrot.slane %v4449_v27, 5  ;;  %v3611_v34 = vrot.slane %v4451_v63, 9 }
  0xc6   : > { %4159 = vmatpush3.bf16.msra.mxu1 %v4308_v44  ;;  %v3608_v44 = vrot.slane %v4809_v0, 9  ;;  %v2235_v20 = vrot.slane %v5191_v14, 5  ;;  %v2241_v54 = vrot.slane %v2239_v28, 4  ;;  %v2242_v2 = vrot.slane %v5225_v60, 5 }
  0xc7   : > { %4129 = vmatmul.mubr.msk.bf16.gmra.mxu0 %vm352_vm2, %v5407_v37  ;;  %v2234_v15 = vrot.slane %v2232_v18, 4 }
  0xc8   : > { %4132 = vmatprep.mubr.msk.bf16.mxu0 %vm352_vm2, %v5409_v5  ;;  %v2212_v0 = vsel %vm4628_vm3, %v3608_v44, %v2211_v59  ;;  %v4453_v59 = vld [vmem:[%s4616_s13 + $0xa0] sm:$0xf]  ;;  %v4454_v44 = vld [vmem:[%s4616_s13 + $0xac] sm:$0xf] }
  0xc9   : > { %4093 = vmatmul.mubr.msk.bf16.gmra.mxu1 %vm352_vm2, %v5147_v6  ;;  %v2207_v6 = vrot.slane %v5101_v62, 5  ;;  %v2215_v62 = vsel %vm4628_vm3, %v2213_v12, %v2214_v29  ;;  %v2236_v14 = vsel %vm4628_vm3, %v2234_v15, %v2235_v20  ;;  %v2246_v49 = vrot.slane %v4453_v59, 5  ;;  %v4457_v20 = vld [vmem:[%s4616_s13 + $0xb8] sm:$0xf] }
  0xca   : > { %4096 = vmatprep.mubr.msk.bf16.mxu1 %vm352_vm2, %v5188_v45  ;;  %v5460_v41 = vcombine.low %v2212_v0, %v2215_v62  ;;  %v2253_v12 = vrot.slane %v4454_v44, 5  ;;  %v1895_v29 = vshrl.u32 %v6479_v58, 16 }
  0xcb   : > { %v2208_v45 = vsel %vm4628_vm3, %v2206_v22, %v2207_v6  ;;  %v2243_v6 = vsel %vm4628_vm3, %v2241_v54, %v2242_v2 }
  0xcc   : > { %v5458_v42 = vcombine.low %v2205_v1, %v2208_v45  ;;  %v1898_v1 = vshll.u32 %v6479_v58, 16  ;;  %v1908_v45 = vshrl.u32 %v5021_v31, 16  ;;  %v2249_v58 = vrot.slane %v5234_v40, 5 }
  0xce   : > { %v1900_v21 = vrot.slane %v1898_v1, 5  ;;  %v1910_v63 = vrot.slane %v1908_v45, 4  ;;  %v2263_v45 = vrot.slane %v5275_v48, 5 }
  0xcf   : > { %4133 = vmatmul.mubr.msk.bf16.gmra.mxu0 %vm352_vm2, %v5433_v35 }
  0xd0   : > { %4136 = vmatprep.mubr.msk.bf16.mxu0 %vm352_vm2, %v5435_v25 }
  0xd1   : > { %4097 = vmatmul.mubr.msk.bf16.gmra.mxu1 %vm352_vm2, %v5196_v50  ;;  %v2227_v50 = vrot.slane %v2225_v56, 4 }
  0xd2   : > { %4100 = vmatprep.mubr.msk.bf16.mxu1 %vm352_vm2, %v5217_v32  ;;  %v2226_v32 = vsel %vm4628_vm3, %v3610_v10, %v2225_v56  ;;  %v3613_v10 = vrot.slane %v4455_v53, 9 }
  0xd3   : > { %v2229_v24 = vsel %vm4628_vm3, %v2227_v50, %v2228_v19  ;;  %v2248_v50 = vrot.slane %v2246_v49, 4 }
  0xd4   : > { %v5478_v47 = vcombine.low %v2226_v32, %v2229_v24  ;;  %v2256_v32 = vrot.slane %v5269_v17, 5  ;;  %v1897_v24 = vrot.slane %v1895_v29, 4  ;;  %v2247_v40 = vsel %vm4628_vm3, %v3613_v10, %v2246_v49  ;;  %v4458_v29 = vld [vmem:[%s4616_s13 + $0xb4] sm:$0xf] }
  0xd5   : > { %v2250_v17 = vsel %vm4628_vm3, %v2248_v50, %v2249_v58  ;;  %v1914_v49 = vshll.u32 %v5339_v7, 16 }
  0xd7   : > { %4137 = vmatmul.mubr.msk.bf16.gmra.mxu0 %vm352_vm2, %v5458_v42  ;;  %v1916_v7 = vrot.slane %v1914_v49, 5 }
  0xd8   : > { %4140 = vmatprep.mubr.msk.bf16.mxu0 %vm352_vm2, %v5460_v41 }
  0xd9   : > { %4101 = vmatmul.mubr.msk.bf16.gmra.mxu1 %vm352_vm2, %v4920_v3  ;;  %v4452_v3 = vld [vmem:[%s4616_s13 + $0x90] sm:$0xf] }
  0xda   : > { %4104 = vmatprep.mubr.msk.bf16.mxu1 %vm352_vm2, %v5264_v13  ;;  %v3612_v38 = vrot.slane %v4452_v3, 9  ;;  %v2233_v13 = vsel %vm4628_vm3, %v3611_v34, %v2232_v18  ;;  %v2255_v18 = vrot.slane %v2253_v12, 4  ;;  %v2260_v3 = vrot.slane %v4457_v20, 5 }
  0xdb   : > { %v5516_v36 = vcombine.low %v2233_v13, %v2236_v14  ;;  %v1901_v14 = vor.u32 %v1900_v21, %v1897_v24 }
  0xdc   : > { %v2240_v22 = vsel %vm4628_vm3, %v3612_v38, %v2239_v28  ;;  %v2257_v13 = vsel %vm4628_vm3, %v2255_v18, %v2256_v32  ;;  %v2262_v1 = vrot.slane %v2260_v3, 4 }
  0xdd   : > { %v5518_v56 = vcombine.low %v2240_v22, %v2243_v6  ;;  %v1902_v53 = vrot.slane %v1901_v14, 4 }
  0xdf   : > { %v5484_v26 = vpop.f32.mrf.mxu0  ;;  %4141 = vmatmul.mubr.msk.bf16.gmra.mxu0 %vm352_vm2, %v5087_v55 }
  0xe0   : > { %4144 = vmatprep.mubr.msk.bf16.mxu0 %vm352_vm2, %v5478_v47  ;;  %v5495_v4 = vpop.f32.mrf.mxu1 }
  0xe1   : > { %4105 = vmatmul.mubr.msk.bf16.gmra.mxu1 %vm352_vm2, %v5266_v46  ;;  %v5499_v60 = vpop.f32.mrf.mxu0  ;;  %v1904_v46 = vshll.u32 %v5021_v31, 16 }
  0xe2   : > { %4108 = vmatprep.mubr.msk.bf16.mxu1 %vm352_vm2, %v5298_v51  ;;  %v5512_v0 = vpop.f32.mrf.mxu1  ;;  %v4456_v51 = vld [vmem:[%s4616_s13 + $0xa8] sm:$0xf] }
  0xe3   : > { %v5514_v62 = vpop.f32.mrf.mxu0  ;;  %v3614_v31 = vrot.slane %v4456_v51, 9  ;;  %v1906_v28 = vrot.slane %v1904_v46, 5  ;;  %v2264_v51 = vsel %vm4628_vm3, %v2262_v1, %v2263_v45 }
  0xe4   : > { %v5522_v19 = vpop.f32.mrf.mxu1 }
  0xe5   : > { %v5524_v27 = vpop.f32.mrf.mxu0  ;;  %v2254_v2 = vsel %vm4628_vm3, %v3614_v31, %v2253_v12  ;;  %v1911_v59 = vor.u32 %v1910_v63, %v1906_v28  ;;  %v3615_v12 = vrot.slane %v4458_v29, 9  ;;  %v1907_v32 = vsel %vm4843_vm6, %v1902_v53, %v1906_v28 }
  0xe6   : > { %v5528_v34 = vpop.f32.mrf.mxu1  ;;  %v5560_v44 = vcombine.low %v2254_v2, %v2257_v13 }
  0xe7   : > { %v5530_v15 = vpop.f32.mrf.mxu0  ;;  %4145 = vmatmul.mubr.msk.bf16.gmra.mxu0 %vm352_vm2, %v5516_v36  ;;  %v1912_v10 = vrot.slane %v1911_v59, 4  ;;  %v2261_v48 = vsel %vm4628_vm3, %v3615_v12, %v2260_v3 }
  0xe8   : > { %4148 = vmatprep.mubr.msk.bf16.mxu0 %vm352_vm2, %v5518_v56  ;;  %v5541_v38 = vpop.f32.mrf.mxu1 }
  0xe9   : > { %4109 = vmatmul.mubr.msk.bf16.gmra.mxu1 %vm352_vm2, %v5300_v61  ;;  %v5545_v54 = vpop.f32.mrf.mxu0  ;;  %v5558_v61 = vcombine.low %v2247_v40, %v2250_v17  ;;  %v1917_v24 = vsel %vm4843_vm6, %v1912_v10, %v1916_v7  ;;  %v5596_v40 = vcombine.low %v2261_v48, %v2264_v51 }
  0xea   : > { %4112 = vmatprep.mubr.msk.bf16.mxu1 %vm352_vm2, %v5322_v11  ;;  %v5554_v22 = vpop.f32.mrf.mxu1  ;;  %v3581_v20 = vcombine.low %v1907_v32, %v1917_v24 }
  0xeb   : > { %v5556_v6 = vpop.f32.mrf.mxu0 }
  0xec   : > { %v5564_v46 = vpop.f32.mrf.mxu1 }
  0xed   : > { %v5566_v11 = vpop.f32.mrf.mxu0 }
  0xee   : > { %v5568_v50 = vpop.f32.mrf.mxu1 }
  0xef   : > { %v5570_v58 = vpop.f32.mrf.mxu0  ;;  %4149 = vmatmul.mubr.msk.bf16.gmra.mxu0 %vm352_vm2, %v5558_v61 }
  0xf0   : > { %4152 = vmatprep.mubr.msk.bf16.mxu0 %vm352_vm2, %v5560_v44  ;;  %v5580_v31 = vpop.f32.mrf.mxu1 }
  0xf1   : > { %4113 = vmatmul.mubr.msk.bf16.gmra.mxu1 %vm352_vm2, %v5324_v30  ;;  %v5584_v18 = vpop.f32.mrf.mxu0 }
  0xf2   : > { %4116 = vmatprep.mubr.msk.bf16.mxu1 %vm352_vm2, %v5345_v52  ;;  %v5592_v21 = vpop.f32.mrf.mxu1 }
  0xf3   : > { %v5594_v63 = vpop.f32.mrf.mxu0 }
  0xf4   : > { %v5598_v17 = vpop.f32.mrf.mxu1 }
  0xf5   : > { %v5600_v30 = vpop.f32.mrf.mxu0 }
  0xf6   : > { %v5602_v3 = vpop.f32.mrf.mxu1 }
  0xf7   : > { %v5604_v52 = vpop.f32.mrf.mxu0  ;;  %4153 = vmatmul.mubr.msk.bf16.gmra.mxu0 %vm352_vm2, %v5596_v40 }
  0xf8   : > { %4196 = vmatprep.mubr.msk.bf16.mxu0 %vm352_vm2, %v5375_v9  ;;  %v5610_v43 = vpop.f32.mrf.mxu1 }
  0xf9   : > { %4117 = vmatmul.mubr.msk.bf16.gmra.mxu1 %vm352_vm2, %v3581_v20  ;;  %v5613_v28 = vpop.f32.mrf.mxu0 }
  0xfa   : > { %4160 = vmatprep.mubr.msk.bf16.mxu1 %vm352_vm2, %v6486_v39  ;;  %v5617_v2 = vpop.f32.mrf.mxu1 }
  0xfb   : > { %v5619_v13 = vpop.f32.mrf.mxu0 }
  0xfc   : > { %v5621_v14 = vpop.f32.mrf.mxu1 }
  0xfd   : > { %v5623_v59 = vpop.f32.mrf.mxu0 }
  0xfe   : > { %v5625_v49 = vpop.f32.mrf.mxu1 }
  0xff   : > { %v3982_v29 = vpop.f32.mrf.mxu0  ;;  %4197 = vmatmul.mubr.msk.bf16.vlgmr.msra.gmra.mxu0 %vm352_vm2, %v5407_v37 }
 0x100   : > { %4200 = vmatprep.mubr.msk.bf16.mxu0 %vm352_vm2, %v5409_v5 }
 0x101   : > { %v3946_v12 = vpop.f32.mrf.mxu1  ;;  %4161 = vmatmul.mubr.msk.bf16.vlgmr.msra.gmra.mxu1 %vm352_vm2, %v5375_v9  ;;  %v802_v39 = vpop.f32.mrf.mxu0 }
 0x102   : > { %v625_v1 = vadd.f32 %v3946_v12, %v5484_v26  ;;  %4164 = vmatprep.mubr.msk.bf16.mxu1 %vm352_vm2, %v5407_v37 }
 0x103   : > { %v616_v45 = vpop.f32.mrf.mxu1  ;;  %v3983_v53 = vpop.f32.mrf.mxu0 }
 0x104   : > { %v5636_v10 = vadd.f32 %v3982_v29, %v625_v1  ;;  %v617_v7 = vadd.f32 %v616_v45, %v5499_v60 }
 0x105   : > { %v3947_v48 = vpop.f32.mrf.mxu1  ;;  %v805_v51 = vpop.f32.mrf.mxu0 }
 0x106   : > { %v5639_v32 = vadd.f32 %v802_v39, %v617_v7  ;;  %v628_v24 = vadd.f32 %v3947_v48, %v5514_v62 }
 0x107   : > { %v619_v20 = vpop.f32.mrf.mxu1  ;;  %v3986_v9 = vpop.f32.mrf.mxu0  ;;  %4201 = vmatmul.mubr.msk.bf16.gmra.mxu0 %vm352_vm2, %v5433_v35 }
 0x108   : > { %v5644_v26 = vadd.f32 %v3983_v53, %v628_v24  ;;  %v620_v37 = vadd.f32 %v619_v20, %v5524_v27  ;;  %4204 = vmatprep.mubr.msk.bf16.mxu0 %vm352_vm2, %v5435_v25 }
 0x109   : > { %v3950_v29 = vpop.f32.mrf.mxu1  ;;  %4165 = vmatmul.mubr.msk.bf16.gmra.mxu1 %vm352_vm2, %v5409_v5  ;;  %v818_v60 = vpop.f32.mrf.mxu0 }
 0x10a   : > { %v5651_v12 = vadd.f32 %v805_v51, %v620_v37  ;;  %v641_v62 = vadd.f32 %v3950_v29, %v5530_v15  ;;  %4168 = vmatprep.mubr.msk.bf16.mxu1 %vm352_vm2, %v5433_v35 }
 0x10b   : > { %v632_v39 = vpop.f32.mrf.mxu1  ;;  %v3987_v1 = vpop.f32.mrf.mxu0 }
 0x10c   : > { %v5656_v45 = vadd.f32 %v3986_v9, %v641_v62  ;;  %v633_v27 = vadd.f32 %v632_v39, %v5545_v54 }
 0x10d   : > { %v3951_v53 = vpop.f32.mrf.mxu1  ;;  %v821_v7 = vpop.f32.mrf.mxu0 }
 0x10e   : > { %v5659_v48 = vadd.f32 %v818_v60, %v633_v27  ;;  %v644_v5 = vadd.f32 %v3951_v53, %v5556_v6 }
 0x10f   : > { %v635_v24 = vpop.f32.mrf.mxu1  ;;  %v3990_v51 = vpop.f32.mrf.mxu0  ;;  %4205 = vmatmul.mubr.msk.bf16.gmra.mxu0 %vm352_vm2, %v5458_v42 }
 0x110   : > { %v5664_v15 = vadd.f32 %v3987_v1, %v644_v5  ;;  %v636_v35 = vadd.f32 %v635_v24, %v5566_v11  ;;  %4208 = vmatprep.mubr.msk.bf16.mxu0 %vm352_vm2, %v5460_v41 }
 0x111   : > { %v3954_v20 = vpop.f32.mrf.mxu1  ;;  %4169 = vmatmul.mubr.msk.bf16.gmra.mxu1 %vm352_vm2, %v5435_v25  ;;  %v834_v54 = vpop.f32.mrf.mxu0 }
 0x112   : > { %v5671_v9 = vadd.f32 %v821_v7, %v636_v35  ;;  %v657_v6 = vadd.f32 %v3954_v20, %v5570_v58  ;;  %4172 = vmatprep.mubr.msk.bf16.mxu1 %vm352_vm2, %v5458_v42 }
 0x113   : > { %v648_v37 = vpop.f32.mrf.mxu1  ;;  %v3991_v29 = vpop.f32.mrf.mxu0 }
 0x114   : > { %v5676_v60 = vadd.f32 %v3990_v51, %v657_v6  ;;  %v649_v11 = vadd.f32 %v648_v37, %v5584_v18 }
 0x115   : > { %v3955_v62 = vpop.f32.mrf.mxu1  ;;  %v837_v39 = vpop.f32.mrf.mxu0 }
 0x116   : > { %v5679_v1 = vadd.f32 %v834_v54, %v649_v11  ;;  %v660_v25 = vadd.f32 %v3955_v62, %v5594_v63  ;;  %v4459_v62 = vld [vmem:[%s4616_s13 + $0xc4] sm:$0xf] }
 0x117   : > { %v651_v27 = vpop.f32.mrf.mxu1  ;;  %v3994_v53 = vpop.f32.mrf.mxu0  ;;  %4209 = vmatmul.mubr.msk.bf16.gmra.mxu0 %vm352_vm2, %v5087_v55 }
 0x118   : > { %v5684_v58 = vadd.f32 %v3991_v29, %v660_v25  ;;  %v652_v42 = vadd.f32 %v651_v27, %v5600_v30  ;;  %4212 = vmatprep.mubr.msk.bf16.mxu0 %vm352_vm2, %v5478_v47 }
 0x119   : > { %v3958_v7 = vpop.f32.mrf.mxu1  ;;  %4173 = vmatmul.mubr.msk.bf16.gmra.mxu1 %vm352_vm2, %v5460_v41  ;;  %v850_v18 = vpop.f32.mrf.mxu0 }
 0x11a   : > { %v5691_v5 = vadd.f32 %v837_v39, %v652_v42  ;;  %v673_v63 = vadd.f32 %v3958_v7, %v5604_v52  ;;  %4176 = vmatprep.mubr.msk.bf16.mxu1 %vm352_vm2, %v5087_v55 }
 0x11b   : > { %v664_v24 = vpop.f32.mrf.mxu1  ;;  %v3995_v51 = vpop.f32.mrf.mxu0 }
 0x11c   : > { %v5696_v35 = vadd.f32 %v3994_v53, %v673_v63  ;;  %v665_v30 = vadd.f32 %v664_v24, %v5613_v28  ;;  %v4460_v63 = vld [vmem:[%s4616_s13 + $0xc0] sm:$0xf] }
 0x11d   : > { %v3959_v20 = vpop.f32.mrf.mxu1  ;;  %v853_v54 = vpop.f32.mrf.mxu0 }
 0x11e   : > { %v5699_v6 = vadd.f32 %v850_v18, %v665_v30  ;;  %v676_v41 = vadd.f32 %v3959_v20, %v5619_v13  ;;  %v2574_v13 = vrot.slane %v4459_v62, 5 }
 0x11f   : > { %v667_v37 = vpop.f32.mrf.mxu1  ;;  %v3998_v29 = vpop.f32.mrf.mxu0  ;;  %4213 = vmatmul.mubr.msk.bf16.gmra.mxu0 %vm352_vm2, %v5516_v36 }
 0x120   : > { %v5704_v52 = vadd.f32 %v3995_v51, %v676_v41  ;;  %v668_v55 = vadd.f32 %v667_v37, %v5623_v59  ;;  %4216 = vmatprep.mubr.msk.bf16.mxu0 %vm352_vm2, %v5518_v56  ;;  %v2576_v24 = vrot.slane %v2574_v13, 4  ;;  %v2577_v51 = vrot.slane %v5303_v23, 5 }
 0x121   : > { %v3962_v28 = vpop.f32.mrf.mxu1  ;;  %4177 = vmatmul.mubr.msk.bf16.gmra.mxu1 %vm352_vm2, %v5478_v47  ;;  %v866_v11 = vpop.f32.mrf.mxu0  ;;  %v3654_v47 = vrot.slane %v4460_v63, 9 }
 0x122   : > { %v5712_v39 = vadd.f32 %v853_v54, %v668_v55  ;;  %v689_v25 = vadd.f32 %v3962_v28, %v5495_v4  ;;  %4180 = vmatprep.mubr.msk.bf16.mxu1 %vm352_vm2, %v5516_v36  ;;  %v2578_v37 = vsel %vm4628_vm3, %v2576_v24, %v2577_v51 }
 0x123   : > { %v680_v27 = vpop.f32.mrf.mxu1  ;;  %v3999_v59 = vpop.f32.mrf.mxu0 }
 0x124   : > { %v5717_v53 = vadd.f32 %v3998_v29, %v689_v25  ;;  %v681_v42 = vadd.f32 %v680_v27, %v5512_v0 }
 0x125   : > { %v3963_v7 = vpop.f32.mrf.mxu1  ;;  %v869_v18 = vpop.f32.mrf.mxu0 }
 0x126   : > { %v5722_v30 = vadd.f32 %v866_v11, %v681_v42  ;;  %v692_v4 = vadd.f32 %v3963_v7, %v5522_v19  ;;  %v2575_v19 = vsel %vm4628_vm3, %v3654_v47, %v2574_v13 }
 0x127   : > { %v683_v20 = vpop.f32.mrf.mxu1  ;;  %v4002_v54 = vpop.f32.mrf.mxu0  ;;  %4217 = vmatmul.mubr.msk.bf16.gmra.mxu0 %vm352_vm2, %v5558_v61  ;;  %v3659_v62 = vcombine.low %v2575_v19, %v2578_v37 }
 0x128   : > { %v5727_v36 = vadd.f32 %v3999_v59, %v692_v4  ;;  %v684_v0 = vadd.f32 %v683_v20, %v5528_v34  ;;  %4220 = vmatprep.mubr.msk.bf16.mxu0 %vm352_vm2, %v5560_v44 }
 0x129   : > { %v3966_v41 = vpop.f32.mrf.mxu1  ;;  %4181 = vmatmul.mubr.msk.bf16.gmra.mxu1 %vm352_vm2, %v5518_v56  ;;  %v882_v23 = vpop.f32.mrf.mxu0 }
 0x12a   : > { %v5738_v29 = vadd.f32 %v869_v18, %v684_v0  ;;  %v705_v55 = vadd.f32 %v3966_v41, %v5541_v38  ;;  %4184 = vmatprep.mubr.msk.bf16.mxu1 %vm352_vm2, %v5558_v61 }
 0x12b   : > { %v696_v34 = vpop.f32.mrf.mxu1  ;;  %v4003_v28 = vpop.f32.mrf.mxu0 }
 0x12c   : > { %v5743_v11 = vadd.f32 %v4002_v54, %v705_v55  ;;  %v697_v56 = vadd.f32 %v696_v34, %v5554_v22 }
 0x12d   : > { %v3967_v25 = vpop.f32.mrf.mxu1  ;;  %v885_v27 = vpop.f32.mrf.mxu0 }
 0x12e   : > { %v5746_v13 = vadd.f32 %v882_v23, %v697_v56  ;;  %v708_v8 = vadd.f32 %v3967_v25, %v5564_v46 }
 0x12f   : > { %v699_v59 = vpop.f32.mrf.mxu1  ;;  %v4006_v42 = vpop.f32.mrf.mxu0  ;;  %4221 = vmatmul.mubr.msk.bf16.gmra.mxu0 %vm352_vm2, %v5596_v40 }
 0x130   : > { %v5751_v38 = vadd.f32 %v4003_v28, %v708_v8  ;;  %v700_v61 = vadd.f32 %v699_v59, %v5568_v50  ;;  %4224 = vmatprep.mubr.msk.bf16.mxu0 %vm352_vm2, %v3659_v62 }
 0x131   : > { %v3970_v7 = vpop.f32.mrf.mxu1  ;;  %4185 = vmatmul.mubr.msk.bf16.gmra.mxu1 %vm352_vm2, %v5560_v44  ;;  %v898_v22 = vpop.f32.mrf.mxu0 }
 0x132   : > { %v5757_v18 = vadd.f32 %v885_v27, %v700_v61  ;;  %v721_v46 = vadd.f32 %v3970_v7, %v5580_v31  ;;  %4188 = vmatprep.mubr.msk.bf16.mxu1 %vm352_vm2, %v5596_v40 }
 0x133   : > { %v712_v63 = vpop.f32.mrf.mxu1  ;;  %v4007_v47 = vpop.f32.mrf.mxu0 }
 0x134   : > { %v5762_v24 = vadd.f32 %v4006_v42, %v721_v46  ;;  %v713_v50 = vadd.f32 %v712_v63, %v5592_v21 }
 0x135   : > { %v3971_v51 = vpop.f32.mrf.mxu1  ;;  %v901_v4 = vpop.f32.mrf.mxu0 }
 0x136   : > { %v5765_v20 = vadd.f32 %v898_v22, %v713_v50  ;;  %v724_v44 = vadd.f32 %v3971_v51, %v5598_v17 }
 0x137   : > { %v715_v54 = vpop.f32.mrf.mxu1  ;;  %v4010_v0 = vpop.f32.mrf.mxu0  ;;  %4225 = vmatmul.mubr.msk.bf16.gmra.mxu0 %vm352_vm2, %v3683_v33 }
 0x138   : > { %v5772_v31 = vadd.f32 %v4007_v47, %v724_v44  ;;  %v716_v40 = vadd.f32 %v715_v54, %v5602_v3 }
 0x139   : > { %v3974_v41 = vpop.f32.mrf.mxu1  ;;  %4189 = vmatmul.mubr.msk.bf16.gmra.mxu1 %vm352_vm2, %v3659_v62  ;;  %v914_v21 = vpop.f32.mrf.mxu0 }
 0x13a   : > { %v5776_v23 = vadd.f32 %v901_v4, %v716_v40  ;;  %v737_v19 = vadd.f32 %v3974_v41, %v5610_v43 }
 0x13b   : > { %v728_v17 = vpop.f32.mrf.mxu1  ;;  %v4011_v37 = vpop.f32.mrf.mxu0 }
 0x13c   : > { %v5779_v55 = vadd.f32 %v4010_v0, %v737_v19  ;;  %v729_v57 = vadd.f32 %v728_v17, %v5617_v2 }
 0x13d   : > { %v3975_v16 = vpop.f32.mrf.mxu1  ;;  %v917_v33 = vpop.f32.mrf.mxu0 }
 0x13e   : > { %v5782_v34 = vadd.f32 %v914_v21, %v729_v57  ;;  %v740_v3 = vadd.f32 %v3975_v16, %v5621_v14 }
 0x13f   : > { %v731_v28 = vpop.f32.mrf.mxu1  ;;  %v4054_v56 = vpop.f32.mrf.mxu0 }
 0x140   : > { %v5785_v62 = vadd.f32 %v4011_v37, %v740_v3  ;;  %v732_v25 = vadd.f32 %v731_v28, %v5625_v49 }
 0x141   : > { %v4018_v27 = vpop.f32.mrf.mxu1  ;;  %v1735_v43 = vpop.f32.mrf.mxu0 }
 0x142   : > { %v5788_v8 = vadd.f32 %v917_v33, %v732_v25  ;;  %v1624_v59 = vadd.f32 %v4018_v27, %v5636_v10 }
 0x143   : > { %v1495_v42 = vpop.f32.mrf.mxu1  ;;  %v4055_v2 = vpop.f32.mrf.mxu0 }
 0x144   : > { %v5791_v61 = vadd.f32 %v4054_v56, %v1624_v59  ;;  %v1622_v7 = vadd.f32 %v1495_v42, %v5639_v32 }
 0x145   : > { %v4019_v22 = vpop.f32.mrf.mxu1  ;;  %v1738_v14 = vpop.f32.mrf.mxu0 }
 0x146   : > { %v5794_v46 = vadd.f32 %v1735_v43, %v1622_v7  ;;  %v1625_v63 = vadd.f32 %v4019_v22, %v5644_v26 }
 0x147   : > { %v1498_v47 = vpop.f32.mrf.mxu1  ;;  %v4058_v49 = vpop.f32.mrf.mxu0 }
 0x148   : > { %v5797_v50 = vadd.f32 %v4055_v2, %v1625_v63  ;;  %v1623_v51 = vadd.f32 %v1498_v47, %v5651_v12 }
 0x149   : > { %v4022_v4 = vpop.f32.mrf.mxu1  ;;  %v1751_v10 = vpop.f32.mrf.mxu0 }
 0x14a   : > { %v5800_v44 = vadd.f32 %v1738_v14, %v1623_v51  ;;  %v1628_v54 = vadd.f32 %v4022_v4, %v5656_v45 }
 0x14b   : > { %v1511_v0 = vpop.f32.mrf.mxu1  ;;  %v4059_v32 = vpop.f32.mrf.mxu0 }
 0x14c   : > { %v5803_v40 = vadd.f32 %v4058_v49, %v1628_v54  ;;  %v1626_v41 = vadd.f32 %v1511_v0, %v5659_v48 }
 0x14d   : > { %v4023_v21 = vpop.f32.mrf.mxu1  ;;  %v1754_v26 = vpop.f32.mrf.mxu0 }
 0x14e   : > { %v5806_v19 = vadd.f32 %v1751_v10, %v1626_v41  ;;  %v1629_v17 = vadd.f32 %v4023_v21, %v5664_v15 }
 0x14f   : > { %v1514_v37 = vpop.f32.mrf.mxu1  ;;  %v4062_v12 = vpop.f32.mrf.mxu0 }
 0x150   : > { %v5809_v57 = vadd.f32 %v4059_v32, %v1629_v17  ;;  %v1627_v16 = vadd.f32 %v1514_v37, %v5671_v9 }
 0x151   : > { %v4026_v33 = vpop.f32.mrf.mxu1  ;;  %v1767_v45 = vpop.f32.mrf.mxu0 }
 0x152   : > { %v5812_v3 = vadd.f32 %v1754_v26, %v1627_v16  ;;  %v1632_v28 = vadd.f32 %v4026_v33, %v5676_v60 }
 0x153   : > { %v1527_v56 = vpop.f32.mrf.mxu1  ;;  %v4063_v48 = vpop.f32.mrf.mxu0 }
 0x154   : > { %v5815_v25 = vadd.f32 %v4062_v12, %v1632_v28  ;;  %v1630_v27 = vadd.f32 %v1527_v56, %v5679_v1 }
 0x155   : > { %v4027_v43 = vpop.f32.mrf.mxu1  ;;  %v1770_v15 = vpop.f32.mrf.mxu0 }
 0x156   : > { %v5818_v59 = vadd.f32 %v1767_v45, %v1630_v27  ;;  %v1633_v42 = vadd.f32 %v4027_v43, %v5684_v58 }
 0x157   : > { %v1530_v2 = vpop.f32.mrf.mxu1  ;;  %v4066_v9 = vpop.f32.mrf.mxu0 }
 0x158   : > { %v5821_v7 = vadd.f32 %v4063_v48, %v1633_v42  ;;  %v1631_v22 = vadd.f32 %v1530_v2, %v5691_v5 }
 0x159   : > { %v4030_v14 = vpop.f32.mrf.mxu1  ;;  %v1783_v60 = vpop.f32.mrf.mxu0 }
 0x15a   : > { %v5824_v63 = vadd.f32 %v1770_v15, %v1631_v22  ;;  %v1636_v47 = vadd.f32 %v4030_v14, %v5696_v35 }
 0x15b   : > { %v1543_v49 = vpop.f32.mrf.mxu1  ;;  %v4067_v1 = vpop.f32.mrf.mxu0 }
 0x15c   : > { %v5827_v51 = vadd.f32 %v4066_v9, %v1636_v47  ;;  %v1634_v4 = vadd.f32 %v1543_v49, %v5699_v6 }
 0x15d   : > { %v4031_v10 = vpop.f32.mrf.mxu1  ;;  %v1786_v58 = vpop.f32.mrf.mxu0 }
 0x15e   : > { %6487 = vst [vmem:[#allocation7_spill] sm:$0xff] %v5827_v51  ;;  %v5830_v54 = vadd.f32 %v1783_v60, %v1634_v4  ;;  %v1637_v0 = vadd.f32 %v4031_v10, %v5704_v52 }
 0x15f   : > { %v1546_v32 = vpop.f32.mrf.mxu1  ;;  %v4070_v5 = vpop.f32.mrf.mxu0 }
 0x160   : > { %6488 = vst [vmem:[#allocation8_spill] sm:$0xff] %v5830_v54  ;;  %v5833_v41 = vadd.f32 %v4067_v1, %v1637_v0  ;;  %v1635_v21 = vadd.f32 %v1546_v32, %v5712_v39 }
 0x161   : > { %v4034_v26 = vpop.f32.mrf.mxu1  ;;  %v1799_v35 = vpop.f32.mrf.mxu0 }
 0x162   : > { %6489 = vst [vmem:[#allocation9_spill] sm:$0xff] %v5833_v41  ;;  %v5836_v17 = vadd.f32 %v1786_v58, %v1635_v21  ;;  %v1640_v37 = vadd.f32 %v4034_v26, %v5717_v53 }
 0x163   : > { %v1559_v12 = vpop.f32.mrf.mxu1  ;;  %v4071_v6 = vpop.f32.mrf.mxu0 }
 0x164   : > { %6490 = vst [vmem:[#allocation5_spill] sm:$0xff] %v5836_v17  ;;  %v5839_v16 = vadd.f32 %v4070_v5, %v1640_v37  ;;  %v1638_v33 = vadd.f32 %v1559_v12, %v5722_v30 }
 0x165   : > { %v4035_v45 = vpop.f32.mrf.mxu1  ;;  %v1802_v52 = vpop.f32.mrf.mxu0 }
 0x166   : > { %6491 = vst [vmem:[#allocation15_spill] sm:$0xff] %v5839_v16  ;;  %v5842_v28 = vadd.f32 %v1799_v35, %v1638_v33  ;;  %v1641_v56 = vadd.f32 %v4035_v45, %v5727_v36 }
 0x167   : > { %v1562_v48 = vpop.f32.mrf.mxu1  ;;  %v4074_v39 = vpop.f32.mrf.mxu0 }
 0x168   : > { %6492 = vst [vmem:[#allocation10_spill] sm:$0xff] %v5842_v28  ;;  %v5845_v27 = vadd.f32 %v4071_v6, %v1641_v56  ;;  %v1639_v43 = vadd.f32 %v1562_v48, %v5738_v29 }
 0x169   : > { %v4038_v15 = vpop.f32.mrf.mxu1  ;;  %v1815_v53 = vpop.f32.mrf.mxu0 }
 0x16a   : > { %6493 = vst [vmem:[#allocation11_spill] sm:$0xff] %v5845_v27  ;;  %v5848_v42 = vadd.f32 %v1802_v52, %v1639_v43  ;;  %v1644_v2 = vadd.f32 %v4038_v15, %v5743_v11 }
 0x16b   : > { %v1575_v9 = vpop.f32.mrf.mxu1  ;;  %v4075_v30 = vpop.f32.mrf.mxu0 }
 0x16c   : > { %6494 = vst [vmem:[#allocation13_spill] sm:$0xff] %v5848_v42  ;;  %v5851_v22 = vadd.f32 %v4074_v39, %v1644_v2  ;;  %v1642_v14 = vadd.f32 %v1575_v9, %v5746_v13 }
 0x16d   : > { %v4039_v60 = vpop.f32.mrf.mxu1  ;;  %v1818_v36 = vpop.f32.mrf.mxu0 }
 0x16e   : > { %6495 = vst [vmem:[#allocation6_spill] sm:$0xff] %v5851_v22  ;;  %v5854_v47 = vadd.f32 %v1815_v53, %v1642_v14  ;;  %v1645_v49 = vadd.f32 %v4039_v60, %v5751_v38 }
 0x16f   : > { %v1578_v1 = vpop.f32.mrf.mxu1  ;;  %v4078_v29 = vpop.f32.mrf.mxu0 }
 0x170   : > { %v5857_v4 = vadd.f32 %v4075_v30, %v1645_v49  ;;  %v1643_v10 = vadd.f32 %v1578_v1, %v5757_v18 }
 0x171   : > { %v4042_v58 = vpop.f32.mrf.mxu1  ;;  %v1831_v11 = vpop.f32.mrf.mxu0 }
 0x172   : > { %v5860_v0 = vadd.f32 %v1818_v36, %v1643_v10  ;;  %v1648_v32 = vadd.f32 %v4042_v58, %v5762_v24 }
 0x173   : > { %v1591_v5 = vpop.f32.mrf.mxu1  ;;  %v4079_v13 = vpop.f32.mrf.mxu0 }
 0x174   : > { %v5863_v21 = vadd.f32 %v4078_v29, %v1648_v32  ;;  %v1646_v26 = vadd.f32 %v1591_v5, %v5765_v20 }
 0x175   : > { %v4043_v35 = vpop.f32.mrf.mxu1  ;;  %v1834_v38 = vpop.f32.mrf.mxu0 }
 0x176   : > { %v5866_v37 = vadd.f32 %v1831_v11, %v1646_v26  ;;  %v1649_v12 = vadd.f32 %v4043_v35, %v5772_v31 }
 0x177   : > { %v1594_v6 = vpop.f32.mrf.mxu1  ;;  %v4082_v18 = vpop.f32.mrf.mxu0 }
 0x178   : > { %v5869_v33 = vadd.f32 %v4079_v13, %v1649_v12  ;;  %v1647_v45 = vadd.f32 %v1594_v6, %v5776_v23 }
 0x179   : > { %v4046_v52 = vpop.f32.mrf.mxu1  ;;  %v1847_v24 = vpop.f32.mrf.mxu0 }
 0x17a   : > { %v5872_v56 = vadd.f32 %v1834_v38, %v1647_v45  ;;  %v1652_v48 = vadd.f32 %v4046_v52, %v5779_v55 }
 0x17b   : > { %v1607_v39 = vpop.f32.mrf.mxu1  ;;  %v4083_v20 = vpop.f32.mrf.mxu0 }
 0x17c   : > { %v5875_v43 = vadd.f32 %v4082_v18, %v1652_v48  ;;  %v1650_v15 = vadd.f32 %v1607_v39, %v5782_v34 }
 0x17d   : > { %v4047_v53 = vpop.f32.mrf.mxu1  ;;  %v1850_v31 = vpop.f32.mrf.mxu0 }
 0x17e   : > { %v5878_v2 = vadd.f32 %v1847_v24, %v1650_v15  ;;  %v1653_v9 = vadd.f32 %v4047_v53, %v5785_v62 }
 0x17f   : > { %v1610_v30 = vpop.f32.mrf.mxu1  ;;  %v5881_v23 = vpop.f32.mrf.mxu0 }
 0x180   : > { %v5883_v14 = vadd.f32 %v4083_v20, %v1653_v9  ;;  %v1651_v60 = vadd.f32 %v1610_v30, %v5788_v8 }
 0x181   : > { %v5886_v55 = vpop.f32.mrf.mxu1  ;;  %v5888_v36 = vpop.f32.mrf.mxu0 }
 0x182   : > { %v5890_v49 = vadd.f32 %v1850_v31, %v1651_v60 }
 0x183   : > { %v5892_v34 = vpop.f32.mrf.mxu1  ;;  %v5894_v1 = vpop.f32.mrf.mxu0 }
 0x185   : > { %v5896_v29 = vpop.f32.mrf.mxu1  ;;  %v5898_v62 = vpop.f32.mrf.mxu0 }
 0x187   : > { %v5900_v10 = vpop.f32.mrf.mxu1  ;;  %v5902_v58 = vpop.f32.mrf.mxu0 }
 0x189   : > { %v5904_v11 = vpop.f32.mrf.mxu1  ;;  %v5906_v8 = vpop.f32.mrf.mxu0 }
 0x18b   : > { %v5908_v32 = vpop.f32.mrf.mxu1  ;;  %v5910_v5 = vpop.f32.mrf.mxu0 }
 0x18d   : > { %v5912_v13 = vpop.f32.mrf.mxu1  ;;  %v5914_v26 = vpop.f32.mrf.mxu0 }
 0x18f   : > { %v5916_v35 = vpop.f32.mrf.mxu1  ;;  %v5918_v38 = vpop.f32.mrf.mxu0 }
 0x191   : > { %v5920_v12 = vpop.f32.mrf.mxu1  ;;  %v5922_v6 = vpop.f32.mrf.mxu0 }
 0x193   : > { %v5924_v18 = vpop.f32.mrf.mxu1  ;;  %v5926_v45 = vpop.f32.mrf.mxu0 }
 0x195   : > { %v5928_v52 = vpop.f32.mrf.mxu1  ;;  %v5930_v24 = vpop.f32.mrf.mxu0 }
 0x197   : > { %v5932_v48 = vpop.f32.mrf.mxu1  ;;  %v5934_v39 = vpop.f32.mrf.mxu0 }
 0x198   : > { %6496 = vst [vmem:[#allocation14_spill] sm:$0xff] %v5934_v39 }
 0x199   : > { %v5936_v20 = vpop.f32.mrf.mxu1  ;;  %v5938_v15 = vpop.f32.mrf.mxu0 }
 0x19a   : > { %6497 = vst [vmem:[#allocation12_spill] sm:$0xff] %v5936_v20  ;;  %6498 = vst [vmem:[#allocation16_spill] sm:$0xff] %v5938_v15 }
 0x19b   : > { %v5940_v53 = vpop.f32.mrf.mxu1  ;;  %v5942_v31 = vpop.f32.mrf.mxu0 }
 0x19c   : > { %6499 = vst [vmem:[#allocation17_spill] sm:$0xff] %v5940_v53  ;;  %6500 = vst [vmem:[#allocation18_spill] sm:$0xff] %v5942_v31 }
 0x19d   : > { %v5944_v9 = vpop.f32.mrf.mxu1  ;;  %v5946_v30 = vpop.f32.mrf.mxu0 }
 0x19e   : > { %6501 = vst [vmem:[#allocation19_spill] sm:$0xff] %v5944_v9  ;;  %6502 = vst [vmem:[#allocation20_spill] sm:$0xff] %v5946_v30 }
 0x19f   : > { %v5948_v60 = vpop.f32.mrf.mxu1  ;;  %v5950_v22 = vpop.f32.mrf.mxu0 }
 0x1a0   : > { %6503 = vst [vmem:[#allocation21_spill] sm:$0xff] %v5948_v60  ;;  %6504 = vst [vmem:[#allocation22_spill] sm:$0xff] %v5950_v22 }
 0x1a1   : > { %v5952_v42 = vpop.f32.mrf.mxu1  ;;  %v5954_v27 = vpop.f32.mrf.mxu0 }
 0x1a2   : > { %6505 = vst [vmem:[#allocation23_spill] sm:$0xff] %v5952_v42  ;;  %6506 = vst [vmem:[#allocation24_spill] sm:$0xff] %v5954_v27 }
 0x1a3   : > { %v5956_v28 = vpop.f32.mrf.mxu1  ;;  %v5958_v16 = vpop.f32.mrf.mxu0 }
 0x1a4   : > { %6507 = vst [vmem:[#allocation25_spill] sm:$0xff] %v5956_v28  ;;  %6508 = vst [vmem:[#allocation26_spill] sm:$0xff] %v5958_v16 }
 0x1a5   : > { %v5960_v15 = vpop.f32.mrf.mxu1  ;;  %v5962_v39 = vpop.f32.mrf.mxu0 }
 0x1a6   : > { %6509 = vst [vmem:[#allocation27_spill] sm:$0xff] %v5960_v15  ;;  %6510 = vst [vmem:[#allocation28_spill] sm:$0xff] %v5962_v39 }
 0x1a7   : > { %v5964_v31 = vpop.f32.mrf.mxu1  ;;  %v5966_v17 = vpop.f32.mrf.mxu0 }
 0x1a8   : > { %6511 = vst [vmem:[#allocation29_spill] sm:$0xff] %v5964_v31  ;;  %6512 = vst [vmem:[#allocation30_spill] sm:$0xff] %v5966_v17 }
 0x1a9   : > { %v5968_v30 = vpop.f32.mrf.mxu1  ;;  %v2492_v60 = vpop.f32.mrf.mxu0 }
 0x1aa   : > { %6513 = vst [vmem:[#allocation31_spill] sm:$0xff] %v5968_v30 }
 0x1ab   : > { %v2055_v22 = vpop.f32.mrf.mxu1  ;;  %v4147_v9 = vpop.f32.mrf.mxu0 }
 0x1ac   : > { %v2122_v42 = vadd.f32 %v2055_v22, %v5854_v47 }
 0x1ad   : > { %v4111_v27 = vpop.f32.mrf.mxu1  ;;  %v2495_v41 = vpop.f32.mrf.mxu0 }
 0x1ae   : > { %v5971_v28 = vadd.f32 %v2492_v60, %v2122_v42  ;;  %v2125_v16 = vadd.f32 %v4111_v27, %v5857_v4 }
 0x1af   : > { %v2058_v15 = vpop.f32.mrf.mxu1  ;;  %v4150_v53 = vpop.f32.mrf.mxu0 }
 0x1b0   : > { %v5974_v39 = vadd.f32 %v4147_v9, %v2125_v16  ;;  %v2123_v31 = vadd.f32 %v2058_v15, %v5860_v0 }
 0x1b1   : > { %v4114_v17 = vpop.f32.mrf.mxu1  ;;  %v2508_v54 = vpop.f32.mrf.mxu0 }
 0x1b2   : > { %v5977_v30 = vadd.f32 %v2495_v41, %v2123_v31  ;;  %v2128_v20 = vadd.f32 %v4114_v17, %v5863_v21 }
 0x1b3   : > { %v2071_v51 = vpop.f32.mrf.mxu1  ;;  %v4151_v22 = vpop.f32.mrf.mxu0 }
 0x1b4   : > { %v5980_v47 = vadd.f32 %v4150_v53, %v2128_v20  ;;  %v2126_v42 = vadd.f32 %v2071_v51, %v5866_v37 }
 0x1b5   : > { %v4115_v60 = vpop.f32.mrf.mxu1  ;;  %v2511_v27 = vpop.f32.mrf.mxu0 }
 0x1b6   : > { %v5983_v4 = vadd.f32 %v2508_v54, %v2126_v42  ;;  %v2129_v16 = vadd.f32 %v4115_v60, %v5869_v33  ;;  %v2104_v54 = vadd.f32 %v5886_v55, %v5791_v61  ;;  %v2105_v61 = vadd.f32 %v5896_v29, %v5797_v50 }
 0x1b7   : > { %v2074_v9 = vpop.f32.mrf.mxu1  ;;  %v4154_v0 = vpop.f32.mrf.mxu0  ;;  %v2106_v50 = vadd.f32 %v5908_v32, %v5806_v19  ;;  %v2109_v29 = vadd.f32 %v5912_v13, %v5809_v57  ;;  %v2112_v19 = vadd.f32 %v5920_v12, %v5815_v25  ;;  %v2110_v57 = vadd.f32 %v5924_v18, %v5818_v59  ;;  %v6036_v32 = vld [vmem:[%s6435_s3] ss:$0 sm:$0xff] }
 0x1b8   : > { %v5986_v15 = vadd.f32 %v4151_v22, %v2129_v16  ;;  %v2127_v41 = vadd.f32 %v2074_v9, %v5872_v56  ;;  %v2102_v56 = vadd.f32 %v5892_v34, %v5794_v46  ;;  %v2541_v9 = vadd.f32 %v5881_v23, %v2104_v54 }
 0x1b9   : > { %v4118_v31 = vpop.f32.mrf.mxu1  ;;  %v2524_v17 = vpop.f32.mrf.mxu0  ;;  %v2103_v46 = vadd.f32 %v5900_v10, %v5800_v44  ;;  %v2108_v23 = vadd.f32 %v5904_v11, %v5803_v40  ;;  %v2542_v44 = vadd.f32 %v5894_v1, %v2105_v61  ;;  %v2107_v40 = vadd.f32 %v5916_v35, %v5812_v3 }
 0x1ba   : > { %v5989_v21 = vadd.f32 %v2511_v27, %v2127_v41  ;;  %v2132_v20 = vadd.f32 %v4118_v31, %v5875_v43  ;;  %v2539_v31 = vadd.f32 %v5888_v36, %v2102_v56  ;;  %v2113_v11 = vadd.f32 %v5928_v52, %v5821_v7 }
 0x1bb   : > { %v2087_v53 = vpop.f32.mrf.mxu1  ;;  %v4155_v51 = vpop.f32.mrf.mxu0  ;;  %v2545_v25 = vadd.f32 %v5902_v58, %v2108_v23  ;;  %v2543_v59 = vadd.f32 %v5906_v8, %v2106_v50  ;;  %v2546_v12 = vadd.f32 %v5910_v5, %v2109_v29  ;;  %v2111_v7 = vadd.f32 %v5932_v48, %v5824_v63  ;;  %v6518_v50 = vld [vmem:[#allocation9_spill] sm:$0xff] }
 0x1bc   : > { %v5994_v37 = vadd.f32 %v4154_v0, %v2132_v20  ;;  %v2130_v33 = vadd.f32 %v2087_v53, %v5878_v2  ;;  %v2540_v53 = vadd.f32 %v5898_v62, %v2103_v46  ;;  %v2549_v58 = vadd.f32 %v5918_v38, %v2112_v19  ;;  %v6515_v38 = vld [vmem:[#allocation12_spill] sm:$0xff] }
 0x1bd   : > { %v4119_v42 = vpop.f32.mrf.mxu1  ;;  %v2527_v22 = vpop.f32.mrf.mxu0  ;;  %v2547_v8 = vadd.f32 %v5922_v6, %v2110_v57  ;;  %v6053_v5 = vadd.f32 %v5926_v45, %v2113_v11  ;;  %v6516_v6 = vld [vmem:[#allocation8_spill] sm:$0xff] }
 0x1be   : > { %v5999_v60 = vadd.f32 %v2524_v17, %v2130_v33  ;;  %v2133_v27 = vadd.f32 %v4119_v42, %v5883_v14 }
 0x1bf   : > { %v2090_v16 = vpop.f32.mrf.mxu1  ;;  %v4198_v43 = vpop.f32.mrf.mxu0 }
 0x1c0   : > { %v6005_v55 = vadd.f32 %v4155_v51, %v2133_v27  ;;  %v2131_v2 = vadd.f32 %v2090_v16, %v5890_v49  ;;  %v6022_v49 = vld [vmem:[%s6434_s2] ss:$0 sm:$0xff] }
 0x1c1   : > { %v4162_v0 = vpop.f32.mrf.mxu1  ;;  %v2860_v41 = vpop.f32.mrf.mxu0 }
 0x1c2   : > { %v6011_v34 = vadd.f32 %v2527_v22, %v2131_v2  ;;  %v2765_v14 = vadd.f32 %v4162_v0, %v2541_v9  ;;  %v2544_v22 = vadd.f32 %v5914_v26, %v2107_v40  ;;  %v6061_v9 = vadd.f32 %v5930_v24, %v2111_v7  ;;  %v6514_v26 = vld [vmem:[#allocation7_spill] sm:$0xff]  ;;  %v6517_v2 = vld [vmem:[#allocation17_spill] sm:$0xff] }
 0x1c3   : > { %v2636_v36 = vpop.f32.mrf.mxu1  ;;  %v4199_v17 = vpop.f32.mrf.mxu0  ;;  %v2116_v61 = vadd.f32 %v6515_v38, %v6514_v26  ;;  %v2114_v45 = vadd.f32 %v6517_v2, %v6516_v6  ;;  %v6519_v24 = vld [vmem:[#allocation19_spill] sm:$0xff] }
 0x1c4   : > { %v2989_v10 = vadd.f32 %v4198_v43, %v2765_v14  ;;  %v2763_v20 = vadd.f32 %v2636_v36, %v2539_v31  ;;  %v2117_v29 = vadd.f32 %v6519_v24, %v6518_v50  ;;  %v6520_v36 = vld [vmem:[#allocation5_spill] sm:$0xff]  ;;  %v6526_v6 = vld [vmem:[#allocation15_spill] sm:$0xff] }
 0x1c5   : > { %v4163_v1 = vpop.f32.mrf.mxu1  ;;  %v2863_v13 = vpop.f32.mrf.mxu0 }
 0x1c6   : > { %v3028_v3 = vmul.f32 %v6022_v49, %v2989_v10  ;;  %v2987_v35 = vadd.f32 %v2860_v41, %v2763_v20  ;;  %v2766_v51 = vadd.f32 %v4163_v1, %v2542_v44 }
 0x1c7   : > { %v2639_v18 = vpop.f32.mrf.mxu1  ;;  %v4202_v52 = vpop.f32.mrf.mxu0 }
 0x1c8   : > { %v6046_v54 = vadd.f32 %v6036_v32, %v3028_v3  ;;  %v3026_v62 = vmul.f32 %v6022_v49, %v2987_v35  ;;  %v2990_v33 = vadd.f32 %v4199_v17, %v2766_v51  ;;  %v2764_v42 = vadd.f32 %v2639_v18, %v2540_v53  ;;  %v6521_v17 = vld [vmem:[#allocation21_spill] sm:$0xff]  ;;  %v6523_v3 = vld [vmem:[#allocation16_spill] sm:$0xff] }
 0x1c9   : > { %v4166_v56 = vpop.f32.mrf.mxu1  ;;  %v2876_v63 = vpop.f32.mrf.mxu0  ;;  %v2115_v44 = vadd.f32 %v6521_v17, %v6520_v36  ;;  %v6084_v35 = vadd.f32 %v6523_v3, %v2114_v45  ;;  %v6528_v45 = vld [vmem:[#allocation10_spill] sm:$0xff]  ;;  %v6530_v17 = vld [vmem:[#allocation11_spill] sm:$0xff] }
 0x1ca   : > { %v3706_v48 = vmul.f32 -1.442695, %v6046_v54  ;;  %v6057_v27 = vadd.f32 %v6036_v32, %v3026_v62  ;;  %v3029_v16 = vmul.f32 %v6022_v49, %v2990_v33  ;;  %v2988_v43 = vadd.f32 %v2863_v13, %v2764_v42  ;;  %v6522_v13 = vld [vmem:[#allocation14_spill] sm:$0xff] }
 0x1cb   : > { %v2769_v0 = vadd.f32 %v4166_v56, %v2545_v25  ;;  %v2652_v41 = vpop.f32.mrf.mxu1  ;;  %v4203_v31 = vpop.f32.mrf.mxu0  ;;  %v6081_v53 = vadd.f32 %v6522_v13, %v2116_v61  ;;  %v6524_v33 = vld [vmem:[#allocation18_spill] sm:$0xff] }
 0x1cc   : > { %4310 = vpow2.f32 %v3706_v48  ;;  %v3704_v46 = vmul.f32 -1.442695, %v6057_v27  ;;  %v6069_v14 = vadd.f32 %v6036_v32, %v3029_v16  ;;  %v3027_v23 = vmul.f32 %v6022_v49, %v2988_v43 }
 0x1cd   : > { %v2993_v10 = vadd.f32 %v4202_v52, %v2769_v0  ;;  %v2767_v20 = vadd.f32 %v2652_v41, %v2543_v59  ;;  %v4167_v40 = vpop.f32.mrf.mxu1  ;;  %v2879_v19 = vpop.f32.mrf.mxu0  ;;  %v6089_v42 = vadd.f32 %v6524_v33, %v2117_v29  ;;  %v6529_v0 = vld [vmem:[#allocation25_spill] sm:$0xff] }
 0x1ce   : > { %4312 = vpow2.f32 %v3704_v46  ;;  %v3707_v57 = vmul.f32 -1.442695, %v6069_v14  ;;  %v6078_v11 = vadd.f32 %v6036_v32, %v3027_v23  ;;  %v2770_v1 = vadd.f32 %v4167_v40, %v2546_v12  ;;  %v6525_v12 = vld [vmem:[#allocation20_spill] sm:$0xff]  ;;  %v6533_v40 = vld [vmem:[#allocation29_spill] sm:$0xff] }
 0x1cf   : > { %v3032_v51 = vmul.f32 %v6022_v49, %v2993_v10  ;;  %v2991_v25 = vadd.f32 %v2876_v63, %v2767_v20  ;;  %v2655_v7 = vpop.f32.mrf.mxu1  ;;  %v4206_v59 = vpop.f32.mrf.mxu0  ;;  %v6092_v56 = vadd.f32 %v6525_v12, %v2115_v44  ;;  %v2118_v41 = vadd.f32 %v6529_v0, %v6528_v45  ;;  %v6531_v44 = vld [vmem:[#allocation27_spill] sm:$0xff]  ;;  %v6532_v20 = vld [vmem:[#allocation13_spill] sm:$0xff] }
 0x1d0   : > { %4314 = vpow2.f32 %v3707_v57  ;;  %v3705_v18 = vmul.f32 -1.442695, %v6078_v11  ;;  %v2994_v52 = vadd.f32 %v4203_v31, %v2770_v1  ;;  %v2768_v62 = vadd.f32 %v2655_v7, %v2544_v22  ;;  %v6527_v22 = vld [vmem:[#allocation23_spill] sm:$0xff] }
 0x1d1   : > { %v6095_v48 = vadd.f32 %v6036_v32, %v3032_v51  ;;  %v3030_v16 = vmul.f32 %v6022_v49, %v2991_v25  ;;  %v4170_v43 = vpop.f32.mrf.mxu1  ;;  %v2892_v63 = vpop.f32.mrf.mxu0  ;;  %v2120_v2 = vadd.f32 %v6527_v22, %v6526_v6  ;;  %v2121_v10 = vadd.f32 %v6531_v44, %v6530_v17  ;;  %v6537_v6 = vld [vmem:[#allocation28_spill] sm:$0xff] }
 0x1d2   : > { %4316 = vpow2.f32 %v3705_v18  ;;  %v3033_v26 = vmul.f32 %v6022_v49, %v2994_v52  ;;  %v2992_v38 = vadd.f32 %v2879_v19, %v2768_v62  ;;  %v2773_v61 = vadd.f32 %v4170_v43, %v2549_v58  ;;  %v6535_v18 = vld [vmem:[#allocation24_spill] sm:$0xff] }
 0x1d3   : > { %v3710_v31 = vmul.f32 -1.442695, %v6095_v48  ;;  %v6105_v46 = vadd.f32 %v6036_v32, %v3030_v16  ;;  %v2668_v23 = vpop.f32.mrf.mxu1  ;;  %v4207_v50 = vpop.f32.mrf.mxu0  ;;  %v2119_v19 = vadd.f32 %v6533_v40, %v6532_v20  ;;  %v6125_v52 = vadd.f32 %v6535_v18, %v2118_v41 }
 0x1d4   : > { %v6108_v24 = vadd.f32 %v6036_v32, %v3033_v26  ;;  %v3031_v29 = vmul.f32 %v6022_v49, %v2992_v38  ;;  %v2997_v36 = vadd.f32 %v4206_v59, %v2773_v61  ;;  %v2771_v58 = vadd.f32 %v2668_v23, %v2547_v8  ;;  %v6534_v8 = vld [vmem:[#allocation22_spill] sm:$0xff] }
 0x1d5   : > { %4318 = vpow2.f32 %v3710_v31  ;;  %v3708_v57 = vmul.f32 -1.442695, %v6105_v46  ;;  %v4171_v1 = vpop.f32.mrf.mxu1  ;;  %v2895_v13 = vpop.f32.mrf.mxu0  ;;  %v6122_v59 = vadd.f32 %v6534_v8, %v2120_v2  ;;  %v6536_v38 = vld [vmem:[#allocation26_spill] sm:$0xff]  ;;  %v6137_v22 = vadd.f32 %v6537_v6, %v2119_v19 }
 0x1d6   : > { %v3711_v3 = vmul.f32 -1.442695, %v6108_v24  ;;  %v6118_v51 = vadd.f32 %v6036_v32, %v3031_v29  ;;  %v3036_v25 = vmul.f32 %v6022_v49, %v2997_v36  ;;  %v2995_v7 = vadd.f32 %v2892_v63, %v2771_v58  ;;  %v6538_v36 = vld [vmem:[#allocation6_spill] sm:$0xff]  ;;  %v6539_v58 = vld [vmem:[#allocation31_spill] sm:$0xff] }
 0x1d7   : > { %4320 = vpow2.f32 %v3708_v57  ;;  %v2774_v62 = vadd.f32 %v4171_v1, %v6053_v5  ;;  %v2671_v33 = vpop.f32.mrf.mxu1  ;;  %v4210_v12 = vpop.f32.mrf.mxu0  ;;  %v6134_v61 = vadd.f32 %v6536_v38, %v2121_v10  ;;  %v2124_v17 = vadd.f32 %v6539_v58, %v6538_v36 }
 0x1d8   : > { %4322 = vpow2.f32 %v3711_v3  ;;  %v3709_v16 = vmul.f32 -1.442695, %v6118_v51  ;;  %v6130_v43 = vadd.f32 %v6036_v32, %v3036_v25  ;;  %v3034_v26 = vmul.f32 %v6022_v49, %v2995_v7 }
 0x1d9   : > { %v4311_v63 = vpop.eup %4310  ;;  %v2998_v2 = vadd.f32 %v4207_v50, %v2774_v62  ;;  %v2772_v5 = vadd.f32 %v2671_v33, %v6061_v9  ;;  %v4174_v45 = vpop.f32.mrf.mxu1 }
 0x1da   : > { %v2908_v0 = vpop.f32.mrf.mxu0  ;;  %v3195_v41 = vadd.f32 1.0, %v4311_v63  ;;  %4324 = vpow2.f32 %v3709_v16  ;;  %v3714_v31 = vmul.f32 -1.442695, %v6130_v43  ;;  %v6142_v23 = vadd.f32 %v6036_v32, %v3034_v26 }
 0x1db   : > { %v4313_v29 = vpop.eup %4312  ;;  %v3037_v44 = vmul.f32 %v6022_v49, %v2998_v2  ;;  %v2996_v10 = vadd.f32 %v2895_v13, %v2772_v5  ;;  %v2777_v50 = vadd.f32 %v4174_v45, %v6081_v53  ;;  %v2684_v20 = vpop.f32.mrf.mxu1 }
 0x1dc   : > { %v4211_v9 = vpop.f32.mrf.mxu0  ;;  %4326 = vrcp.f32 %v3195_v41  ;;  %v3193_v40 = vadd.f32 1.0, %v4313_v29  ;;  %v3712_v19 = vmul.f32 -1.442695, %v6142_v23  ;;  %v2775_v57 = vadd.f32 %v2684_v20, %v6084_v35 }
 0x1dd   : > { %v4315_v1 = vpop.eup %4314  ;;  %4328 = vpow2.f32 %v3714_v31  ;;  %v6151_v3 = vadd.f32 %v6036_v32, %v3037_v44  ;;  %v3035_v25 = vmul.f32 %v6022_v49, %v2996_v10  ;;  %v3001_v7 = vadd.f32 %v4210_v12, %v2777_v50  ;;  %v4175_v8 = vpop.f32.mrf.mxu1 }
 0x1de   : > { %v2911_v13 = vpop.f32.mrf.mxu0  ;;  %4330 = vrcp.f32 %v3193_v40  ;;  %v3196_v53 = vadd.f32 1.0, %v4315_v1  ;;  %v2999_v18 = vadd.f32 %v2908_v0, %v2775_v57  ;;  %v2778_v62 = vadd.f32 %v4175_v8, %v6089_v42  ;;  %v6540_v40 = vld [vmem:[#allocation30_spill] sm:$0xff] }
 0x1df   : > { %v4317_v33 = vpop.eup %4316  ;;  %4332 = vpow2.f32 %v3712_v19  ;;  %v3715_v16 = vmul.f32 -1.442695, %v6151_v3  ;;  %v6157_v35 = vadd.f32 %v6036_v32, %v3035_v25  ;;  %v3040_v26 = vmul.f32 %v6022_v49, %v3001_v7  ;;  %v2687_v63 = vpop.f32.mrf.mxu1 }
 0x1e0   : > { %v4214_v38 = vpop.f32.mrf.mxu0  ;;  %4334 = vrcp.f32 %v3196_v53  ;;  %v3194_v12 = vadd.f32 1.0, %v4317_v33  ;;  %v3038_v6 = vmul.f32 %v6022_v49, %v2999_v18  ;;  %v3002_v2 = vadd.f32 %v4211_v9, %v2778_v62 }
 0x1e1   : > { %4336 = vpow2.f32 %v3715_v16  ;;  %v3713_v42 = vmul.f32 -1.442695, %v6157_v35  ;;  %v6163_v5 = vadd.f32 %v6036_v32, %v3040_v26  ;;  %v2776_v45 = vadd.f32 %v2687_v63, %v6092_v56  ;;  %v4178_v0 = vpop.f32.mrf.mxu1 }
 0x1e2   : > { %v2924_v41 = vpop.f32.mrf.mxu0  ;;  %v4319_v31 = vpop.eup %4318  ;;  %4338 = vrcp.f32 %v3194_v12  ;;  %v6167_v29 = vadd.f32 %v6036_v32, %v3038_v6  ;;  %v3041_v36 = vmul.f32 %v6022_v49, %v3002_v2  ;;  %v2781_v58 = vadd.f32 %v4178_v0, %v6122_v59 }
 0x1e3   : > { %v3199_v44 = vadd.f32 1.0, %v4319_v31  ;;  %4340 = vpow2.f32 %v3713_v42  ;;  %v3718_v10 = vmul.f32 -1.442695, %v6163_v5  ;;  %v3000_v50 = vadd.f32 %v2911_v13, %v2776_v45  ;;  %v2700_v20 = vpop.f32.mrf.mxu1 }
 0x1e4   : > { %v4215_v56 = vpop.f32.mrf.mxu0  ;;  %v4321_v9 = vpop.eup %4320  ;;  %v2561_v19 = vadd.f32 %v6540_v40, %v2124_v17  ;;  %v6175_v57 = vadd.f32 %v6036_v32, %v3041_v36  ;;  %v3005_v1 = vadd.f32 %v4214_v38, %v2781_v58  ;;  %v2779_v25 = vadd.f32 %v2700_v20, %v6125_v52 }
 0x1e5   : > { %v4323_v7 = vpop.eup %4322  ;;  %4342 = vrcp.f32 %v3199_v44  ;;  %v3197_v59 = vadd.f32 1.0, %v4321_v9  ;;  %v3716_v8 = vmul.f32 -1.442695, %v6167_v29  ;;  %v3039_v53 = vmul.f32 %v6022_v49, %v3000_v50  ;;  %v4179_v18 = vpop.f32.mrf.mxu1 }
 0x1e6   : > { %v2927_v13 = vpop.f32.mrf.mxu0  ;;  %v3200_v62 = vadd.f32 1.0, %v4323_v7  ;;  %4344 = vpow2.f32 %v3718_v10  ;;  %v3719_v17 = vmul.f32 -1.442695, %v6175_v57  ;;  %v3044_v33 = vmul.f32 %v6022_v49, %v3005_v1 }
 0x1e7   : > { %v4325_v16 = vpop.eup %4324  ;;  %4346 = vrcp.f32 %v3197_v59  ;;  %v6187_v52 = vadd.f32 %v6036_v32, %v3039_v53  ;;  %v3003_v26 = vadd.f32 %v2924_v41, %v2779_v25  ;;  %v2782_v63 = vadd.f32 %v4179_v18, %v6134_v61  ;;  %v2703_v38 = vpop.f32.mrf.mxu1 }
 0x1e8   : > { %v4218_v12 = vpop.f32.mrf.mxu0  ;;  %4348 = vrcp.f32 %v3200_v62  ;;  %v3198_v6 = vadd.f32 1.0, %v4325_v16  ;;  %v6191_v2 = vadd.f32 %v6036_v32, %v3044_v33  ;;  %v2780_v42 = vadd.f32 %v2703_v38, %v6137_v22 }
 0x1e9   : > { %v4327_v45 = vpop.eup %4326  ;;  %4350 = vpow2.f32 %v3716_v8  ;;  %v3717_v0 = vmul.f32 -1.442695, %v6187_v52  ;;  %v3042_v31 = vmul.f32 %v6022_v49, %v3003_v26  ;;  %v3006_v36 = vadd.f32 %v4215_v56, %v2782_v63  ;;  %v4182_v41 = vpop.f32.mrf.mxu1 }
 0x1ea   : > { %v2940_v58 = vpop.f32.mrf.mxu0  ;;  %v4329_v61 = vpop.eup %4328  ;;  %v3291_v44 = vmul.f32 %v4327_v45, %v6046_v54  ;;  %4352 = vrcp.f32 %v3198_v6  ;;  %v3722_v10 = vmul.f32 -1.442695, %v6191_v2  ;;  %v3004_v50 = vadd.f32 %v2927_v13, %v2780_v42 }
 0x1eb   : > { %v4331_v20 = vpop.eup %4330  ;;  %v3203_v9 = vadd.f32 1.0, %v4329_v61  ;;  %4354 = vpow2.f32 %v3719_v17  ;;  %v6199_v22 = vadd.f32 %v6036_v32, %v3042_v31  ;;  %v3045_v40 = vmul.f32 %v6022_v49, %v3006_v36  ;;  %v2716_v1 = vpop.f32.mrf.mxu1 }
 0x1ec   : > { %v4219_v56 = vpop.f32.mrf.mxu0  ;;  %v4333_v25 = vpop.eup %4332  ;;  %3324 = vst.msk [vmem:[%s6203_s20 + $0x10] sm:$0xff] %vm3321_vm7, %v3291_v44  ;;  %v3289_v54 = vmul.f32 %v4331_v20, %v6057_v27  ;;  %4356 = vpow2.f32 %v3717_v0  ;;  %v3043_v7 = vmul.f32 %v6022_v49, %v3004_v50  ;;  %v2785_v59 = vadd.f32 %v4182_v41, %v2561_v19 }
 0x1ed   : > { %v4335_v8 = vpop.eup %4334  ;;  %4358 = vrcp.f32 %v3203_v9  ;;  %v3201_v53 = vadd.f32 1.0, %v4333_v25  ;;  %v3720_v18 = vmul.f32 -1.442695, %v6199_v22  ;;  %v6211_v13 = vadd.f32 %v6036_v32, %v3045_v40  ;;  %v4183_v62 = vpop.f32.mrf.mxu1 }
 0x1ee   : > { %v2943_v17 = vpop.f32.mrf.mxu0  ;;  %v4337_v33 = vpop.eup %4336  ;;  %3322 = vst.msk [vmem:[%s6203_s20] sm:$0xff] %vm3321_vm7, %v3289_v54  ;;  %v3292_v27 = vmul.f32 %v4335_v8, %v6069_v14  ;;  %4360 = vpow2.f32 %v3722_v10  ;;  %v6217_v16 = vadd.f32 %v6036_v32, %v3043_v7  ;;  %v3009_v19 = vadd.f32 %v4218_v12, %v2785_v59 }
 0x1ef   : > { %v4339_v26 = vpop.eup %4338  ;;  %4362 = vrcp.f32 %v3201_v53  ;;  %v3204_v63 = vadd.f32 1.0, %v4337_v33  ;;  %v3723_v38 = vmul.f32 -1.442695, %v6211_v13  ;;  %v2783_v6 = vadd.f32 %v2716_v1, %v5971_v28  ;;  %v2719_v42 = vpop.f32.mrf.mxu1 }
 0x1f0   : > { %v4222_v45 = vpop.f32.mrf.mxu0  ;;  %v4341_v0 = vpop.eup %4340  ;;  %3325 = vst.msk [vmem:[%s6203_s20 + $0x18] sm:$0xff] %vm3321_vm7, %v3292_v27  ;;  %v3290_v14 = vmul.f32 %v4339_v26, %v6078_v11  ;;  %4364 = vpow2.f32 %v3720_v18  ;;  %v3721_v31 = vmul.f32 -1.442695, %v6217_v16  ;;  %v3048_v12 = vmul.f32 %v6022_v49, %v3009_v19 }
 0x1f1   : > { %4366 = vrcp.f32 %v3204_v63  ;;  %v3202_v36 = vadd.f32 1.0, %v4341_v0  ;;  %v3007_v41 = vadd.f32 %v2940_v58, %v2783_v6  ;;  %v2786_v61 = vadd.f32 %v4183_v62, %v5974_v39  ;;  %v4186_v44 = vpop.f32.mrf.mxu1 }
 0x1f2   : > { %v2956_v28 = vpop.f32.mrf.mxu0  ;;  %v4343_v10 = vpop.eup %4342  ;;  %3323 = vst.msk [vmem:[%s6203_s20 + $0x8] sm:$0xff] %vm3321_vm7, %v3290_v14  ;;  %4368 = vpow2.f32 %v3723_v38  ;;  %v6230_v50 = vadd.f32 %v6036_v32, %v3048_v12  ;;  %v2784_v11 = vadd.f32 %v2719_v42, %v5977_v30  ;;  %v2789_v20 = vadd.f32 %v4186_v44, %v5980_v47 }
 0x1f3   : > { %v4345_v9 = vpop.eup %4344  ;;  %v3295_v40 = vmul.f32 %v4343_v10, %v6095_v48  ;;  %4370 = vrcp.f32 %v3202_v36  ;;  %v3046_v39 = vmul.f32 %v6022_v49, %v3007_v41  ;;  %v3010_v58 = vadd.f32 %v4219_v56, %v2786_v61  ;;  %v2732_v1 = vpop.f32.mrf.mxu1 }
 0x1f4   : > { %v4223_v25 = vpop.f32.mrf.mxu0  ;;  %v4347_v54 = vpop.eup %4346  ;;  %v3207_v7 = vadd.f32 1.0, %v4345_v9  ;;  %4372 = vpow2.f32 %v3721_v31  ;;  %v3726_v59 = vmul.f32 -1.442695, %v6230_v50  ;;  %v3008_v8 = vadd.f32 %v2943_v17, %v2784_v11 }
 0x1f5   : > { %v4349_v53 = vpop.eup %4348  ;;  %3328 = vst.msk [vmem:[%s6203_s20 + $0x30] sm:$0xff] %vm3321_vm7, %v3295_v40  ;;  %v3293_v30 = vmul.f32 %v4347_v54, %v6105_v46  ;;  %v6241_v47 = vadd.f32 %v6036_v32, %v3046_v39  ;;  %v3049_v48 = vmul.f32 %v6022_v49, %v3010_v58  ;;  %v3013_v56 = vadd.f32 %v4222_v45, %v2789_v20  ;;  %v4187_v18 = vpop.f32.mrf.mxu1 }
 0x1f6   : > { %v2959_v62 = vpop.f32.mrf.mxu0  ;;  %v4351_v33 = vpop.eup %4350  ;;  %v3296_v27 = vmul.f32 %v4349_v53, %v6108_v24  ;;  %4374 = vrcp.f32 %v3207_v7  ;;  %v3047_v17 = vmul.f32 %v6022_v49, %v3008_v8  ;;  %v2787_v19 = vadd.f32 %v2732_v1, %v5983_v4 }
 0x1f7   : > { %v4353_v26 = vpop.eup %4352  ;;  %3326 = vst.msk [vmem:[%s6203_s20 + $0x20] sm:$0xff] %vm3321_vm7, %v3293_v30  ;;  %v3205_v46 = vadd.f32 1.0, %v4351_v33  ;;  %4376 = vpow2.f32 %v3726_v59  ;;  %v3724_v63 = vmul.f32 -1.442695, %v6241_v47  ;;  %v6251_v38 = vadd.f32 %v6036_v32, %v3049_v48  ;;  %v2735_v6 = vpop.f32.mrf.mxu1 }
 0x1f8   : > { %v4355_v42 = vpop.eup %4354  ;;  %3329 = vst.msk [vmem:[%s6203_s20 + $0x38] sm:$0xff] %vm3321_vm7, %v3296_v27  ;;  %v3294_v24 = vmul.f32 %v4353_v26, %v6118_v51  ;;  %v6257_v45 = vadd.f32 %v6036_v32, %v3047_v17  ;;  %v3052_v4 = vmul.f32 %v6022_v49, %v3013_v56  ;;  %v3011_v0 = vadd.f32 %v2956_v28, %v2787_v19  ;;  %v4226_v61 = vpop.f32.mrf.mxu0 }
 0x1f9   : > { %v4357_v14 = vpop.eup %4356  ;;  %4378 = vrcp.f32 %v3205_v46  ;;  %v3208_v31 = vadd.f32 1.0, %v4355_v42  ;;  %v3727_v12 = vmul.f32 -1.442695, %v6251_v38  ;;  %v2790_v36 = vadd.f32 %v4187_v18, %v5986_v15  ;;  %v4190_v41 = vpop.f32.mrf.mxu1 }
 0x1fa   : > { %v4359_v44 = vpop.eup %4358  ;;  %3327 = vst.msk [vmem:[%s6203_s20 + $0x28] sm:$0xff] %vm3321_vm7, %v3294_v24  ;;  %v3206_v10 = vadd.f32 1.0, %v4357_v14  ;;  %4380 = vpow2.f32 %v3724_v63  ;;  %v3725_v51 = vmul.f32 -1.442695, %v6257_v45  ;;  %v6266_v11 = vadd.f32 %v6036_v32, %v3052_v4  ;;  %v2972_v8 = vpop.f32.mrf.mxu0 }
 0x1fb   : > { %v4361_v28 = vpop.eup %4360  ;;  %v3299_v20 = vmul.f32 %v4359_v44, %v6130_v43  ;;  %4382 = vrcp.f32 %v3208_v31  ;;  %v3050_v9 = vmul.f32 %v6022_v49, %v3011_v0  ;;  %v3014_v15 = vadd.f32 %v4223_v25, %v2790_v36  ;;  %v2748_v40 = vpop.f32.mrf.mxu1 }
 0x1fc   : > { %v4363_v39 = vpop.eup %4362  ;;  %4384 = vrcp.f32 %v3206_v10  ;;  %v3211_v58 = vadd.f32 1.0, %v4361_v28  ;;  %v3730_v1 = vmul.f32 -1.442695, %v6266_v11  ;;  %v2788_v54 = vadd.f32 %v2735_v6, %v5989_v21  ;;  %v4227_v42 = vpop.f32.mrf.mxu0 }
 0x1fd   : > { %v4365_v7 = vpop.eup %4364  ;;  %3332 = vst.msk [vmem:[%s6203_s20 + $0x50] sm:$0xff] %vm3321_vm7, %v3299_v20  ;;  %v3297_v59 = vmul.f32 %v4363_v39, %v6142_v23  ;;  %4386 = vpow2.f32 %v3727_v12  ;;  %v6276_v43 = vadd.f32 %v6036_v32, %v3050_v9  ;;  %v3053_v25 = vmul.f32 %v6022_v49, %v3014_v15  ;;  %v4191_v53 = vpop.f32.mrf.mxu1 }
 0x1fe   : > { %v4367_v30 = vpop.eup %4366  ;;  %4388 = vrcp.f32 %v3211_v58  ;;  %v3209_v48 = vadd.f32 1.0, %v4365_v7  ;;  %v3012_v56 = vadd.f32 %v2959_v62, %v2788_v54  ;;  %v2793_v21 = vadd.f32 %v4190_v41, %v5994_v37  ;;  %v2975_v28 = vpop.f32.mrf.mxu0 }
 0x1ff   : > { %v4369_v18 = vpop.eup %4368  ;;  %3330 = vst.msk [vmem:[%s6203_s20 + $0x40] sm:$0xff] %vm3321_vm7, %v3297_v59  ;;  %v3300_v23 = vmul.f32 %v4367_v30, %v6151_v3  ;;  %4390 = vpow2.f32 %v3725_v51  ;;  %v3728_v33 = vmul.f32 -1.442695, %v6276_v43  ;;  %v6285_v27 = vadd.f32 %v6036_v32, %v3053_v25  ;;  %v2751_v46 = vpop.f32.mrf.mxu1 }
 0x200   : > { %v4371_v17 = vpop.eup %4370  ;;  %4392 = vrcp.f32 %v3209_v48  ;;  %v3212_v19 = vadd.f32 1.0, %v4369_v18  ;;  %v3051_v26 = vmul.f32 %v6022_v49, %v3012_v56  ;;  %v3017_v62 = vadd.f32 %v4226_v61, %v2793_v21 }
 0x201   : > { %v4373_v37 = vpop.eup %4372  ;;  %3333 = vst.msk [vmem:[%s6203_s20 + $0x58] sm:$0xff] %vm3321_vm7, %v3300_v23  ;;  %v3298_v63 = vmul.f32 %v4371_v17, %v6157_v35  ;;  %4394 = vpow2.f32 %v3730_v1  ;;  %v3731_v3 = vmul.f32 -1.442695, %v6285_v27  ;;  %v2791_v6 = vadd.f32 %v2748_v40, %v5999_v60 }
 0x202   : > { %4396 = vrcp.f32 %v3212_v19  ;;  %v3210_v24 = vadd.f32 1.0, %v4373_v37  ;;  %v6294_v4 = vadd.f32 %v6036_v32, %v3051_v26  ;;  %v3056_v0 = vmul.f32 %v6022_v49, %v3017_v62 }
 0x203   : > { %v4375_v14 = vpop.eup %4374  ;;  %3331 = vst.msk [vmem:[%s6203_s20 + $0x48] sm:$0xff] %vm3321_vm7, %v3298_v63  ;;  %4398 = vpow2.f32 %v3728_v33  ;;  %v3015_v31 = vadd.f32 %v2972_v8, %v2791_v6  ;;  %v2794_v35 = vadd.f32 %v4191_v53, %v6005_v55  ;;  %v2792_v12 = vadd.f32 %v2751_v46, %v6011_v34 }
 0x204   : > { %v4377_v36 = vpop.eup %4376  ;;  %v3303_v60 = vmul.f32 %v4375_v14, %v6163_v5  ;;  %4400 = vrcp.f32 %v3210_v24  ;;  %v3729_v41 = vmul.f32 -1.442695, %v6294_v4  ;;  %v6304_v61 = vadd.f32 %v6036_v32, %v3056_v0 }
 0x205   : > { %v3215_v44 = vadd.f32 1.0, %v4377_v36  ;;  %4402 = vpow2.f32 %v3731_v3  ;;  %v3054_v10 = vmul.f32 %v6022_v49, %v3015_v31  ;;  %v3018_v51 = vadd.f32 %v4227_v42, %v2794_v35 }
 0x206   : > { %v4379_v20 = vpop.eup %4378  ;;  %3336 = vst.msk [vmem:[%s6203_s20 + $0x70] sm:$0xff] %vm3321_vm7, %v3303_v60  ;;  %4404 = vpow2.f32 %v3729_v41  ;;  %v3734_v55 = vmul.f32 -1.442695, %v6304_v61  ;;  %v3016_v34 = vadd.f32 %v2975_v28, %v2792_v12 }
 0x207   : > { %v4381_v5 = vpop.eup %4380  ;;  %v3301_v9 = vmul.f32 %v4379_v20, %v6167_v29  ;;  %4406 = vrcp.f32 %v3215_v44  ;;  %v6312_v15 = vadd.f32 %v6036_v32, %v3054_v10  ;;  %v3057_v40 = vmul.f32 %v6022_v49, %v3018_v51 }
 0x208   : > { %v4383_v39 = vpop.eup %4382  ;;  %v3213_v58 = vadd.f32 1.0, %v4381_v5  ;;  %4408 = vpow2.f32 %v3734_v55  ;;  %v3055_v1 = vmul.f32 %v6022_v49, %v3016_v34 }
 0x209   : > { %v4385_v54 = vpop.eup %4384  ;;  %3334 = vst.msk [vmem:[%s6203_s20 + $0x60] sm:$0xff] %vm3321_vm7, %v3301_v9  ;;  %v3304_v7 = vmul.f32 %v4383_v39, %v6175_v57  ;;  %v3732_v29 = vmul.f32 -1.442695, %v6312_v15  ;;  %v6321_v59 = vadd.f32 %v6036_v32, %v3057_v40 }
 0x20a   : > { %v4387_v25 = vpop.eup %4386  ;;  %v3302_v8 = vmul.f32 %v4385_v54, %v6187_v52  ;;  %4410 = vrcp.f32 %v3213_v58  ;;  %v6325_v53 = vadd.f32 %v6036_v32, %v3055_v1 }
 0x20b   : > { %v4389_v49 = vpop.eup %4388  ;;  %3337 = vst.msk [vmem:[%s6203_s20 + $0x78] sm:$0xff] %vm3321_vm7, %v3304_v7  ;;  %v3216_v30 = vadd.f32 1.0, %v4387_v25  ;;  %4412 = vpow2.f32 %v3732_v29  ;;  %v3735_v57 = vmul.f32 -1.442695, %v6321_v59 }
 0x20c   : > { %v4391_v48 = vpop.eup %4390  ;;  %3335 = vst.msk [vmem:[%s6203_s20 + $0x68] sm:$0xff] %vm3321_vm7, %v3302_v8  ;;  %v3307_v56 = vmul.f32 %v4389_v49, %v6191_v2  ;;  %v3733_v52 = vmul.f32 -1.442695, %v6325_v53 }
 0x20d   : > { %v4393_v21 = vpop.eup %4392  ;;  %4414 = vrcp.f32 %v3216_v30  ;;  %v3214_v18 = vadd.f32 1.0, %v4391_v48 }
 0x20e   : > { %v4395_v32 = vpop.eup %4394  ;;  %3340 = vst.msk [vmem:[%s6203_s20 + $0x90] sm:$0xff] %vm3321_vm7, %v3307_v56  ;;  %v3305_v23 = vmul.f32 %v4393_v21, %v6199_v22  ;;  %4416 = vpow2.f32 %v3735_v57 }
 0x20f   : > { %v4397_v33 = vpop.eup %4396  ;;  %4418 = vrcp.f32 %v3214_v18  ;;  %v3219_v17 = vadd.f32 1.0, %v4395_v32 }
 0x210   : > { %v4399_v19 = vpop.eup %4398  ;;  %3338 = vst.msk [vmem:[%s6203_s20 + $0x80] sm:$0xff] %vm3321_vm7, %v3305_v23  ;;  %v3308_v2 = vmul.f32 %v4397_v33, %v6211_v13  ;;  %4420 = vpow2.f32 %v3733_v52 }
 0x211   : > { %v4401_v26 = vpop.eup %4400  ;;  %4422 = vrcp.f32 %v3219_v17  ;;  %v3217_v62 = vadd.f32 1.0, %v4399_v19 }
 0x212   : > { %v4403_v46 = vpop.eup %4402  ;;  %3341 = vst.msk [vmem:[%s6203_s20 + $0x98] sm:$0xff] %vm3321_vm7, %v3308_v2  ;;  %v3306_v22 = vmul.f32 %v4401_v26, %v6217_v16 }
 0x213   : > { %v4405_v37 = vpop.eup %4404  ;;  %4424 = vrcp.f32 %v3217_v62  ;;  %v3220_v63 = vadd.f32 1.0, %v4403_v46 }
 0x214   : > { %v4407_v3 = vpop.eup %4406  ;;  %3339 = vst.msk [vmem:[%s6203_s20 + $0x88] sm:$0xff] %vm3321_vm7, %v3306_v22  ;;  %v3218_v6 = vadd.f32 1.0, %v4405_v37 }
 0x215   : > { %v4409_v42 = vpop.eup %4408  ;;  %v3311_v13 = vmul.f32 %v4407_v3, %v6230_v50  ;;  %4426 = vrcp.f32 %v3220_v63 }
 0x216   : > { %4428 = vrcp.f32 %v3218_v6  ;;  %v3223_v24 = vadd.f32 1.0, %v4409_v42 }
 0x217   : > { %v4411_v0 = vpop.eup %4410  ;;  %3344 = vst.msk [vmem:[%s6203_s20 + $0xb0] sm:$0xff] %vm3321_vm7, %v3311_v13 }
 0x218   : > { %v4413_v14 = vpop.eup %4412  ;;  %v3309_v16 = vmul.f32 %v4411_v0, %v6241_v47  ;;  %4430 = vrcp.f32 %v3223_v24 }
 0x219   : > { %v3221_v31 = vadd.f32 1.0, %v4413_v14 }
 0x21a   : > { %v4415_v35 = vpop.eup %4414  ;;  %3342 = vst.msk [vmem:[%s6203_s20 + $0xa0] sm:$0xff] %vm3321_vm7, %v3309_v16 }
 0x21b   : > { %v4417_v12 = vpop.eup %4416  ;;  %v3312_v50 = vmul.f32 %v4415_v35, %v6251_v38  ;;  %4432 = vrcp.f32 %v3221_v31 }
 0x21c   : > { %v4419_v36 = vpop.eup %4418  ;;  %v3224_v60 = vadd.f32 1.0, %v4417_v12 }
 0x21d   : > { %v4421_v41 = vpop.eup %4420  ;;  %3345 = vst.msk [vmem:[%s6203_s20 + $0xb8] sm:$0xff] %vm3321_vm7, %v3312_v50  ;;  %v3310_v44 = vmul.f32 %v4419_v36, %v6257_v45 }
 0x21e   : > { %v4423_v47 = vpop.eup %4422  ;;  %4434 = vrcp.f32 %v3224_v60  ;;  %v3222_v10 = vadd.f32 1.0, %v4421_v41 }
 0x21f   : > { %3343 = vst.msk [vmem:[%s6203_s20 + $0xa8] sm:$0xff] %vm3321_vm7, %v3310_v44  ;;  %v3315_v51 = vmul.f32 %v4423_v47, %v6266_v11 }
 0x220   : > { %v4425_v38 = vpop.eup %4424  ;;  %4436 = vrcp.f32 %v3222_v10 }
 0x221   : > { %3348 = vst.msk [vmem:[%s6203_s20 + $0xd0] sm:$0xff] %vm3321_vm7, %v3315_v51  ;;  %v3313_v28 = vmul.f32 %v4425_v38, %v6276_v43 }
 0x222   : > { %v4427_v45 = vpop.eup %4426 }
 0x223   : > { %v4429_v20 = vpop.eup %4428  ;;  %3346 = vst.msk [vmem:[%s6203_s20 + $0xc0] sm:$0xff] %vm3321_vm7, %v3313_v28  ;;  %v3316_v55 = vmul.f32 %v4427_v45, %v6285_v27 }
 0x224   : > { %v3314_v34 = vmul.f32 %v4429_v20, %v6294_v4 }
 0x225   : > { %v4431_v5 = vpop.eup %4430  ;;  %3349 = vst.msk [vmem:[%s6203_s20 + $0xd8] sm:$0xff] %vm3321_vm7, %v3316_v55 }
 0x226   : > { %3347 = vst.msk [vmem:[%s6203_s20 + $0xc8] sm:$0xff] %vm3321_vm7, %v3314_v34  ;;  %v3319_v11 = vmul.f32 %v4431_v5, %v6304_v61 }
 0x228   : > { %v4433_v43 = vpop.eup %4432  ;;  %3352 = vst.msk [vmem:[%s6203_s20 + $0xf0] sm:$0xff] %vm3321_vm7, %v3319_v11 }
 0x229   : > { %v3317_v9 = vmul.f32 %v4433_v43, %v6312_v15 }
 0x22b   : > { %v4435_v27 = vpop.eup %4434  ;;  %3350 = vst.msk [vmem:[%s6203_s20 + $0xe0] sm:$0xff] %vm3321_vm7, %v3317_v9 }
 0x22c   : > { %v3320_v4 = vmul.f32 %v4435_v27, %v6321_v59 }
 0x22d   : > { %v4437_v40 = vpop.eup %4436 }
 0x22e   : > { %3353 = vst.msk [vmem:[%s6203_s20 + $0xf8] sm:$0xff] %vm3321_vm7, %v3320_v4  ;;  %v3318_v61 = vmul.f32 %v4437_v40, %v6325_v53 }
 0x230   : > { %3351 = vst.msk [vmem:[%s6203_s20 + $0xe8] sm:$0xff] %vm3321_vm7, %v3318_v61 }
 0x231   : > { %4474 = shalt.err (!%p4471_p3)
}
 0x232   : > { %s4475_s8 = scalar_lea.hbm %s6381_s29, 4096  ;;  %s4479_s10 = scalar_lea.hbm %s6436_s4, 8192 }
 0x233   : > { %p4476_p4 = scmp.ne.s32.totalorder %s6381_s29, %s4475_s8  ;;  %p4480_p9 = scmp.lt.s32.totalorder %s6381_s29, %s6436_s4 }
 0x234   : > { %p4481_p10 = scmp.lt.s32.totalorder %s4479_s10, %s4475_s8 }
 0x235   : > { %p4477_p7 = pnand %p4476_p4, %p4589_p5 }
 0x236   : > { %p4482_p11 = por %p4481_p10, %p4480_p9 }
 0x237   : > { %p4478_p8 = pneg %p4477_p7 }
 0x239   : > { %p4483_p12 = pnand %p4482_p11, %p4478_p8 }
 0x23b   : > { %4486 = shalt.err (!%p4483_p12)
}
 0x23c   : > { %s4524_s14 = smov 128   ;;  %s4525_s20 = smov 8  }
 0x23d   : > { %4233 = dma.vmem_to_hbm [thread:$0]  (%p4589_p5), %s6383_s23, 4096, %s6381_s29, %s6392_s19, %s4524_s14, %s4524_s14, %s4525_s20  }
 0x23e PF: > { %p4239_p13 = scmp.ge.s32.totalorder %s4521_s18, 2  ;;  %s3383_s22 = sand.u32 1, %s4509_s15  }
 0x23f   : > { %s3384_s27 = scalar_lea.sflag [#allocation3], %s3383_s22 }
 0x240   : > { %p4236_p0 = pnand %p4239_p13, %p4593_p6 }
 0x242   : > { %p4237_p1 = pneg %p4236_p0 }
 0x244   : > { %4504 = dma.done.wait (%p4237_p1), %s3384_s27, 4096  }
 0x245   : > { %4506 = vsyncadd (%p4237_p1), %s3384_s27, 4294963200  ;;  %p14_p2 = scmp.ge.s32.totalorder %s4576_s21, 4   ;;  %s6541_s15 = smov %s4513_s16 }
 0x246   : > { %s6542_s16 = smov %s4517_s17  ;;  %s6543_s17 = smov %s4587_s24 }
 0x247   : > { %s6544_s18 = smov %s4576_s21  ;;  %16 = sbr.rel (!%p14_p2) target bundleno = 3 (0x3), region = 79 }
 0x24c   :  { %3389 = vsyncpa [#allocation3], 1 }
 0x24d   :  { %3391 = vsyncpa [#allocation3 + $0x1], 1 }

</bundles_post_ra>
